<compile_context>
chip_gen: v5e
topology: v5e:2x2
jax: 0.10.0
libtpu: 0.0.40
codegen_flags: <defaults>
</compile_context>

<pallas_src>
import functools
from types import SimpleNamespace

import jax
import jax.numpy as jnp
from jax.experimental import pallas as pl
from jax.experimental.pallas import tpu as pltpu


LANE = 128
MAX_TILE_ROWS = 64                       # rows of 128 lanes per channel per grid step
VMEM_LIMIT_BYTES = 32 * 1024 * 1024      # within scoped VMEM on v5e/v6e/v7x


def _pick_rows(n_rows, max_rows=MAX_TILE_ROWS):
    """Row-tile: full extent if small; else largest multiple-of-8 divisor <= max_rows."""
    if n_rows <= max_rows:
        return n_rows
    for r in range(max_rows - (max_rows % 8), 7, -8):
        if n_rows % r == 0:
            return r
    # TODO(synk): whole-extent fallback for awkward sizes; may be large on v7x (64 MiB VMEM).
    return n_rows


def _interior_mask(s_step, rows, H, W, pad):
    """Mask of pixels inside the pad_border_aug crop, for a (rows, 128) flat-spatial slab."""
    base = s_step * (rows * LANE)
    rid = jax.lax.broadcasted_iota(jnp.int32, (rows, LANE), 0)
    lid = jax.lax.broadcasted_iota(jnp.int32, (rows, LANE), 1)
    idx = base + rid * LANE + lid
    if (W & (W - 1)) == 0:               # power-of-two width: shifts, no integer div
        shift = W.bit_length() - 1
        h = idx >> shift
        w = idx & (W - 1)
    else:
        h = idx // W
        w = idx - h * W
    return (h >= pad) & (h < H - pad) & (w >= pad) & (w < W - pad)


# ----------------------------------------------------------------------------
# Kernel 1: frame 0 — gauss_scaling + gauss_offset heads + masked regularizer
#           stats + color head (sigmoid) + masked L1 partial, all in one pass.
# ----------------------------------------------------------------------------

def _frame0_kernel(x_ref, w_s_ref, b_s_ref, w_o_ref, b_o_ref, w_c_ref, b_c_ref,
                   scale_ref, off_ref, pred_ref,
                   ssum_ref, scnt_ref, osum_ref, ocnt_ref, l1_ref,
                   *, cin, cout, rows, H, W, pad, scale_thresh, off_thresh_sq):
    s = pl.program_id(1)
    interior = _interior_mask(s, rows, H, W, pad)

    zero_f = jnp.zeros((1, LANE), jnp.float32)
    zero_i = jnp.zeros((1, LANE), jnp.int32)

    # --- gauss_scaling head: exp(1x1 conv), one output channel at a time (VPU + EUP) ---
    ssum, scnt = zero_f, zero_i
    for co in range(cout):
        acc = w_s_ref[co, 0] * x_ref[0, 0]
        for c in range(1, cin):
            acc = acc + w_s_ref[co, c] * x_ref[0, c]
        y = jnp.exp(acc + b_s_ref[co])                         # (rows, 128)
        scale_ref[0, co] = y
        m = y > scale_thresh
        ssum = ssum + jnp.sum(jnp.where(m, y, 0.0), axis=0, keepdims=True)
        scnt = scnt + jnp.sum(m.astype(jnp.int32), axis=0, keepdims=True)
    ssum_ref[0, 0] = ssum
    scnt_ref[0, 0] = scnt

    # --- gauss_offset head: linear 1x1 conv + masked offset^2 stats ---
    osum, ocnt = zero_f, zero_i
    for co in range(cout):
        acc = w_o_ref[co, 0] * x_ref[0, 0]
        for c in range(1, cin):
            acc = acc + w_o_ref[co, c] * x_ref[0, c]
        y = acc + b_o_ref[co]
        off_ref[0, co] = y
        y2 = y * y
        m = y2 > off_thresh_sq
        osum = osum + jnp.sum(jnp.where(m, y2, 0.0), axis=0, keepdims=True)
        ocnt = ocnt + jnp.sum(m.astype(jnp.int32), axis=0, keepdims=True)
    osum_ref[0, 0] = osum
    ocnt_ref[0, 0] = ocnt

    # --- frame-0 color head (sigmoid) fused with pad-masked L1 vs target ---
    l1 = zero_f
    for co in range(cout):
        acc = w_c_ref[co, 0] * x_ref[0, 0]
        for c in range(1, cin):
            acc = acc + w_c_ref[co, c] * x_ref[0, c]
        y = jax.nn.sigmoid(acc + b_c_ref[co])
        pred_ref[0, co] = y
        diff = jnp.abs(y - x_ref[0, co])
        l1 = l1 + jnp.sum(jnp.where(interior, diff, 0.0), axis=0, keepdims=True)
    l1_ref[0, 0] = l1


def frame0_fused(x0, params, scale_thresh, off_thresh, pad):
    B, C, H, W = x0.shape
    S = H * W
    assert S % LANE == 0, "spatial size must be a multiple of 128"  # TODO(synk): pad+mask path
    n_rows = S // LANE
    rows = _pick_rows(n_rows)
    n_steps = n_rows // rows
    cout = params["w_scale"].shape[0]
    xv = x0.reshape(B, C, n_rows, LANE)                       # pure reshape, no transpose

    smem = pl.BlockSpec(memory_space=pltpu.MemorySpace.SMEM)
    head_spec = pl.BlockSpec((1, cout, rows, LANE), lambda b, s: (b, 0, s, 0))
    stat_spec = pl.BlockSpec((1, 1, 1, LANE), lambda b, s: (b, s, 0, 0))
    stat_f = jax.ShapeDtypeStruct((B, n_steps, 1, LANE), jnp.float32)
    stat_i = jax.ShapeDtypeStruct((B, n_steps, 1, LANE), jnp.int32)

    outs = pl.pallas_call(
        functools.partial(_frame0_kernel, cin=C, cout=cout, rows=rows, H=H, W=W,
                          pad=pad, scale_thresh=float(scale_thresh),
                          off_thresh_sq=float(off_thresh) ** 2),
        out_shape=(
            jax.ShapeDtypeStruct((B, cout, n_rows, LANE), jnp.float32),   # gauss_scaling
            jax.ShapeDtypeStruct((B, cout, n_rows, LANE), jnp.float32),   # gauss_offset
            jax.ShapeDtypeStruct((B, cout, n_rows, LANE), jnp.float32),   # color pred (frame 0)
            stat_f, stat_i, stat_f, stat_i, stat_f,                       # lane partials
        ),
        grid=(B, n_steps),
        in_specs=[
            pl.BlockSpec((1, C, rows, LANE), lambda b, s: (b, 0, s, 0)),
            smem, smem, smem, smem, smem, smem,
        ],
        out_specs=(head_spec, head_spec, head_spec,
                   stat_spec, stat_spec, stat_spec, stat_spec, stat_spec),
        compiler_params=pltpu.CompilerParams(
            dimension_semantics=("parallel", "parallel"),
            vmem_limit_bytes=VMEM_LIMIT_BYTES),
    )(xv, params["w_scale"], params["b_scale"], params["w_off"], params["b_off"],
      params["w_color"], params["b_color"])

    scale_v, off_v, pred_v, ssum, scnt, osum, ocnt, l1 = outs
    return (scale_v.reshape(B, cout, H, W),
            off_v.reshape(B, cout, H, W),
            pred_v.reshape(B, cout, H, W),
            jnp.sum(ssum), jnp.sum(scnt), jnp.sum(osum), jnp.sum(ocnt), jnp.sum(l1))


# ----------------------------------------------------------------------------
# Kernel 2: other frames — color head (sigmoid) + pad-masked L1 partial.
# ----------------------------------------------------------------------------

def _frame_color_kernel(x_ref, w_c_ref, b_c_ref, pred_ref, l1_ref,
                        *, cin, cout, rows, H, W, pad):
    s = pl.program_id(1)
    interior = _interior_mask(s, rows, H, W, pad)
    l1 = jnp.zeros((1, LANE), jnp.float32)
    for co in range(cout):
        acc = w_c_ref[co, 0] * x_ref[0, 0]
        for c in range(1, cin):
            acc = acc + w_c_ref[co, c] * x_ref[0, c]
        y = jax.nn.sigmoid(acc + b_c_ref[co])
        pred_ref[0, co] = y
        diff = jnp.abs(y - x_ref[0, co])
        l1 = l1 + jnp.sum(jnp.where(interior, diff, 0.0), axis=0, keepdims=True)
    l1_ref[0, 0] = l1


def color_frame_fused(x, params, pad):
    B, C, H, W = x.shape
    S = H * W
    assert S % LANE == 0, "spatial size must be a multiple of 128"
    n_rows = S // LANE
    rows = _pick_rows(n_rows)
    n_steps = n_rows // rows
    cout = params["w_color"].shape[0]
    xv = x.reshape(B, C, n_rows, LANE)

    smem = pl.BlockSpec(memory_space=pltpu.MemorySpace.SMEM)
    pred, l1 = pl.pallas_call(
        functools.partial(_frame_color_kernel, cin=C, cout=cout, rows=rows,
                          H=H, W=W, pad=pad),
        out_shape=(
            jax.ShapeDtypeStruct((B, cout, n_rows, LANE), jnp.float32),
            jax.ShapeDtypeStruct((B, n_steps, 1, LANE), jnp.float32),
        ),
        grid=(B, n_steps),
        in_specs=[
            pl.BlockSpec((1, C, rows, LANE), lambda b, s: (b, 0, s, 0)),
            smem, smem,
        ],
        out_specs=(
            pl.BlockSpec((1, cout, rows, LANE), lambda b, s: (b, 0, s, 0)),
            pl.BlockSpec((1, 1, 1, LANE), lambda b, s: (b, s, 0, 0)),
        ),
        compiler_params=pltpu.CompilerParams(
            dimension_semantics=("parallel", "parallel"),
            vmem_limit_bytes=VMEM_LIMIT_BYTES),
    )(xv, params["w_color"], params["b_color"])
    return pred.reshape(B, cout, H, W), jnp.sum(l1)


# ----------------------------------------------------------------------------
# Trainer.forward equivalent
# ----------------------------------------------------------------------------

def make_cfg():
    return SimpleNamespace(
        model=SimpleNamespace(gaussian_rendering=True, predict_offset=True),
        dataset=SimpleNamespace(pad_border_aug=2),
        loss=SimpleNamespace(
            mse=SimpleNamespace(weight=1.0, type="l1"),
            ssim=SimpleNamespace(weight=0.0),   # TODO(synk): SSIM not implemented; weight=0 path.
            lpips=SimpleNamespace(weight=0.0),  # TODO(synk): LPIPS needs a pretrained VGG.
            gauss_scale=SimpleNamespace(weight=0.1, thresh=1.0),
            gauss_offset=SimpleNamespace(weight=0.01, thresh=0.1),
        ),
        frame_ids=(0, 1),
    )


def trainer_forward(params, inputs, cfg):
    p = cfg.dataset.pad_border_aug
    losses, outputs = {}, {}

    x0 = inputs[("color_aug", 0, 0)]
    B, C, H, W = x0.shape

    # --- fused frame-0 pass: gauss heads + masked stats + color head + L1 partial ---
    (scaling, offset, pred0, ssum, scnt, osum, ocnt, l1_0) = frame0_fused(
        x0, params, cfg.loss.gauss_scale.thresh, cfg.loss.gauss_offset.thresh, p)
    outputs["gauss_scaling"] = scaling
    outputs["gauss_offset"] = offset

    total_loss = 0.0
    if cfg.model.gaussian_rendering:
        if cfg.loss.gauss_scale.weight > 0:
            cnt = scnt.astype(jnp.float32)
            big_gauss_reg_loss = jnp.where(cnt > 0, ssum / jnp.maximum(cnt, 1.0), 0.0)
            losses["loss/big_gauss_reg_loss"] = big_gauss_reg_loss
            total_loss = total_loss + cfg.loss.gauss_scale.weight * big_gauss_reg_loss
        if cfg.model.predict_offset and cfg.loss.gauss_offset.weight > 0:
            cnt = ocnt.astype(jnp.float32)
            big_offset_reg_loss = jnp.where(cnt > 0, osum / jnp.maximum(cnt, 1.0), 0.0)
            losses["loss/gauss_offset_reg"] = big_offset_reg_loss
            total_loss = total_loss + cfg.loss.gauss_offset.weight * big_offset_reg_loss

        # --- remaining frames: color head + L1 partial (no crop/stack HBM pre-pass) ---
        preds, l1_by_frame = {0: pred0}, {0: l1_0}
        for fid in cfg.frame_ids:
            if fid == 0:
                continue
            preds[fid], l1_by_frame[fid] = color_frame_fused(
                inputs[("color_aug", fid, 0)], params, p)

        Hc, Wc = H - 2 * p, W - 2 * p
        inv_numel = 1.0 / (B * C * Hc * Wc)                  # trace-time constant
        rec_loss = 0.0
        for fid in cfg.frame_ids:
            # TODO(synk): synthetic color head is pointwise, so the full-frame prediction
            # is returned; the L1 loss uses only the interior (crop-equivalent) pixels.
            outputs[("color_gauss", fid, 0)] = preds[fid]
            if cfg.loss.mse.weight > 0 and cfg.loss.mse.type == "l1":
                mse_loss = l1_by_frame[fid] * inv_numel      # mean(|pred - target|) on crop
                losses["loss/mse"] = mse_loss                # matches torch dict-overwrite
                rec_loss = rec_loss + cfg.loss.mse.weight * mse_loss
            # TODO(synk): 'l2' mse type / ssim / lpips branches not exercised by this cfg.
        rec_loss = rec_loss / len(cfg.frame_ids)
        losses["loss/rec"] = rec_loss
        total_loss = total_loss + rec_loss

    losses["loss/total"] = total_loss
    return losses, outputs


# ----------------------------------------------------------------------------
# Pure-JAX reference (silent correctness check; no matmuls to avoid TPU bf16 dot)
# ----------------------------------------------------------------------------

def _ref_head(x, w, bvec, act):
    y = jnp.sum(w[None, :, :, None, None] * x[:, None, :, :, :], axis=2)
    y = y + bvec[None, :, None, None]
    if act == "exp":
        y = jnp.exp(y)
    elif act == "sigmoid":
        y = jax.nn.sigmoid(y)
    return y


def ref_forward(params, inputs, cfg):
    p = cfg.dataset.pad_border_aug
    x0 = inputs[("color_aug", 0, 0)]
    scaling = _ref_head(x0, params["w_scale"], params["b_scale"], "exp")
    offset = _ref_head(x0, params["w_off"], params["b_off"], "none")
    m = scaling > cfg.loss.gauss_scale.thresh
    cnt = jnp.sum(m)
    big = jnp.where(cnt > 0,
                    jnp.sum(jnp.where(m, scaling, 0.0)) / jnp.maximum(cnt, 1), 0.0)
    o2 = offset ** 2
    mo = o2 > cfg.loss.gauss_offset.thresh ** 2
    cnto = jnp.sum(mo)
    off_reg = jnp.where(cnto > 0,
                        jnp.sum(jnp.where(mo, o2, 0.0)) / jnp.maximum(cnto, 1), 0.0)
    total = cfg.loss.gauss_scale.weight * big + cfg.loss.gauss_offset.weight * off_reg
    rec = 0.0
    for fid in cfg.frame_ids:
        xa = inputs[("color_aug", fid, 0)]
        pred = _ref_head(xa, params["w_color"], params["b_color"], "sigmoid")
        tgt = xa[:, :, p:xa.shape[2] - p, p:xa.shape[3] - p]
        predc = pred[:, :, p:pred.shape[2] - p, p:pred.shape[3] - p]
        rec = rec + cfg.loss.mse.weight * jnp.mean(jnp.abs(predc - tgt))
    rec = rec / len(cfg.frame_ids)
    return total + rec, scaling


# ----------------------------------------------------------------------------
# Main
# ----------------------------------------------------------------------------

if __name__ == "__main__":
    cfg = make_cfg()
    B, C, H, W = 2, 3, 16, 16

    key = jax.random.PRNGKey(0)
    k1, k2, k3, k4, k5 = jax.random.split(key, 5)

    inputs = {
        ("color_aug", 0, 0): jax.random.uniform(k1, (B, C, H, W), jnp.float32),
        ("color_aug", 1, 0): jax.random.uniform(k2, (B, C, H, W), jnp.float32),
    }

    params = {  # (cout, cin) weight layout for the synthetic 1x1-conv heads
        "w_color": 0.5 * jax.random.normal(k3, (C, C), jnp.float32),
        "b_color": jnp.zeros((C,), jnp.float32),
        "w_scale": 0.5 * jax.random.normal(k4, (C, C), jnp.float32),
        "b_scale": 0.1 * jnp.ones((C,), jnp.float32),
        "w_off": 0.5 * jax.random.normal(k5, (C, C), jnp.float32),
        "b_off": jnp.zeros((C,), jnp.float32),
    }

    losses, outputs = trainer_forward(params, inputs, cfg)
    total = jax.block_until_ready(losses["loss/total"])

    # Silent correctness checks against a pure-JAX reference
    ref_total, ref_scaling = ref_forward(params, inputs, cfg)
    assert jnp.allclose(total, ref_total, rtol=1e-4, atol=1e-5), (total, ref_total)
    assert jnp.allclose(outputs["gauss_scaling"], ref_scaling, rtol=1e-4, atol=1e-5)

    print("KERNEL_OK")
</pallas_src>

<mosaic_0001>
module attributes {stable_mosaic.version = 11 : i64} {
  func.func @_frame0_kernel(%arg0: i32, %arg1: i32, %arg2: memref<1x3x2x128xf32, #tpu.memory_space<vmem>>, %arg3: memref<3x3xf32, #tpu.memory_space<smem>>, %arg4: memref<3xf32, #tpu.memory_space<smem>>, %arg5: memref<3x3xf32, #tpu.memory_space<smem>>, %arg6: memref<3xf32, #tpu.memory_space<smem>>, %arg7: memref<3x3xf32, #tpu.memory_space<smem>>, %arg8: memref<3xf32, #tpu.memory_space<smem>>, %arg9: memref<1x3x2x128xf32, #tpu.memory_space<vmem>>, %arg10: memref<1x3x2x128xf32, #tpu.memory_space<vmem>>, %arg11: memref<1x3x2x128xf32, #tpu.memory_space<vmem>>, %arg12: memref<1x1x1x128xf32, #tpu.memory_space<vmem>>, %arg13: memref<1x1x1x128xi32, #tpu.memory_space<vmem>>, %arg14: memref<1x1x1x128xf32, #tpu.memory_space<vmem>>, %arg15: memref<1x1x1x128xi32, #tpu.memory_space<vmem>>, %arg16: memref<1x1x1x128xf32, #tpu.memory_space<vmem>>) attributes {dimension_semantics = [#tpu.dimension_semantics<parallel>, #tpu.dimension_semantics<parallel>], iteration_bounds = array<i64: 2, 1>, scalar_prefetch = 0 : i64, scratch_operands = 0 : i64, tpu.core_type = #tpu.core_type<tc>, window_params = [{transform_indices = @transform_0, window_bounds = array<i64: 1, 3, 2, 128>}, {transform_indices = @transform_1, window_bounds = array<i64: 3, 3>}, {transform_indices = @transform_2, window_bounds = array<i64: 3>}, {transform_indices = @transform_3, window_bounds = array<i64: 3, 3>}, {transform_indices = @transform_4, window_bounds = array<i64: 3>}, {transform_indices = @transform_5, window_bounds = array<i64: 3, 3>}, {transform_indices = @transform_6, window_bounds = array<i64: 3>}, {transform_indices = @transform_7, window_bounds = array<i64: 1, 3, 2, 128>}, {transform_indices = @transform_8, window_bounds = array<i64: 1, 3, 2, 128>}, {transform_indices = @transform_9, window_bounds = array<i64: 1, 3, 2, 128>}, {transform_indices = @transform_10, window_bounds = array<i64: 1, 1, 1, 128>}, {transform_indices = @transform_11, window_bounds = array<i64: 1, 1, 1, 128>}, {transform_indices = @transform_12, window_bounds = array<i64: 1, 1, 1, 128>}, {transform_indices = @transform_13, window_bounds = array<i64: 1, 1, 1, 128>}, {transform_indices = @transform_14, window_bounds = array<i64: 1, 1, 1, 128>}]} {
    %c256_i32 = arith.constant 256 : i32
    %0 = arith.muli %arg1, %c256_i32 : i32
    %1 = tpu.iota {dimensions = array<i32: 0>} : vector<2x128xi32>
    %2 = tpu.iota {dimensions = array<i32: 1>} : vector<2x128xi32>
    %c128_i32 = arith.constant 128 : i32
    %3 = vector.broadcast %c128_i32 : i32 to vector<2x128xi32>
    %4 = arith.muli %1, %3 : vector<2x128xi32>
    %5 = vector.broadcast %0 : i32 to vector<2x128xi32>
    %6 = arith.addi %5, %4 : vector<2x128xi32>
    %7 = arith.addi %6, %2 : vector<2x128xi32>
    %c4_i32 = arith.constant 4 : i32
    %8 = vector.broadcast %c4_i32 : i32 to vector<2x128xi32>
    %9 = arith.shrsi %7, %8 : vector<2x128xi32>
    %c15_i32 = arith.constant 15 : i32
    %10 = vector.broadcast %c15_i32 : i32 to vector<2x128xi32>
    %11 = arith.andi %7, %10 : vector<2x128xi32>
    %c2_i32 = arith.constant 2 : i32
    %12 = vector.broadcast %c2_i32 : i32 to vector<2x128xi32>
    %13 = arith.cmpi sge, %9, %12 : vector<2x128xi32>
    %c14_i32 = arith.constant 14 : i32
    %14 = vector.broadcast %c14_i32 : i32 to vector<2x128xi32>
    %15 = arith.cmpi slt, %9, %14 : vector<2x128xi32>
    %16 = arith.andi %13, %15 : vector<2x128xi1>
    %c2_i32_0 = arith.constant 2 : i32
    %17 = vector.broadcast %c2_i32_0 : i32 to vector<2x128xi32>
    %18 = arith.cmpi sge, %11, %17 : vector<2x128xi32>
    %19 = arith.andi %16, %18 : vector<2x128xi1>
    %c14_i32_1 = arith.constant 14 : i32
    %20 = vector.broadcast %c14_i32_1 : i32 to vector<2x128xi32>
    %21 = arith.cmpi slt, %11, %20 : vector<2x128xi32>
    %22 = arith.andi %19, %21 : vector<2x128xi1>
    %cst = arith.constant 0.000000e+00 : f32
    %23 = vector.broadcast %cst : f32 to vector<1x128xf32>
    %c0_i32 = arith.constant 0 : i32
    %24 = vector.broadcast %c0_i32 : i32 to vector<1x128xi32>
    %c0 = arith.constant 0 : index
    %c0_2 = arith.constant 0 : index
    %25 = memref.load %arg3[%c0, %c0_2] : memref<3x3xf32, #tpu.memory_space<smem>>
    %c0_3 = arith.constant 0 : index
    %c0_4 = arith.constant 0 : index
    %c0_5 = arith.constant 0 : index
    %c0_6 = arith.constant 0 : index
    %26 = vector.load %arg2[%c0_3, %c0_4, %c0_5, %c0_6] : memref<1x3x2x128xf32, #tpu.memory_space<vmem>>, vector<1x1x2x128xf32>
    %27 = vector.shape_cast %26 : vector<1x1x2x128xf32> to vector<2x128xf32>
    %28 = vector.broadcast %25 : f32 to vector<2x128xf32>
    %29 = arith.mulf %28, %27 : vector<2x128xf32>
    %c0_7 = arith.constant 0 : index
    %c1 = arith.constant 1 : index
    %30 = memref.load %arg3[%c0_7, %c1] : memref<3x3xf32, #tpu.memory_space<smem>>
    %c0_8 = arith.constant 0 : index
    %c1_9 = arith.constant 1 : index
    %c0_10 = arith.constant 0 : index
    %c0_11 = arith.constant 0 : index
    %31 = vector.load %arg2[%c0_8, %c1_9, %c0_10, %c0_11] : memref<1x3x2x128xf32, #tpu.memory_space<vmem>>, vector<1x1x2x128xf32>
    %32 = vector.shape_cast %31 : vector<1x1x2x128xf32> to vector<2x128xf32>
    %33 = vector.broadcast %30 : f32 to vector<2x128xf32>
    %34 = arith.mulf %33, %32 : vector<2x128xf32>
    %35 = arith.addf %29, %34 : vector<2x128xf32>
    %c0_12 = arith.constant 0 : index
    %c2 = arith.constant 2 : index
    %36 = memref.load %arg3[%c0_12, %c2] : memref<3x3xf32, #tpu.memory_space<smem>>
    %c0_13 = arith.constant 0 : index
    %c2_14 = arith.constant 2 : index
    %c0_15 = arith.constant 0 : index
    %c0_16 = arith.constant 0 : index
    %37 = vector.load %arg2[%c0_13, %c2_14, %c0_15, %c0_16] : memref<1x3x2x128xf32, #tpu.memory_space<vmem>>, vector<1x1x2x128xf32>
    %38 = vector.shape_cast %37 : vector<1x1x2x128xf32> to vector<2x128xf32>
    %39 = vector.broadcast %36 : f32 to vector<2x128xf32>
    %40 = arith.mulf %39, %38 : vector<2x128xf32>
    %41 = arith.addf %35, %40 : vector<2x128xf32>
    %c0_17 = arith.constant 0 : index
    %42 = memref.load %arg4[%c0_17] : memref<3xf32, #tpu.memory_space<smem>>
    %43 = vector.broadcast %42 : f32 to vector<2x128xf32>
    %44 = arith.addf %41, %43 : vector<2x128xf32>
    %45 = math.exp %44 : vector<2x128xf32>
    %c0_18 = arith.constant 0 : index
    %c0_19 = arith.constant 0 : index
    %c0_20 = arith.constant 0 : index
    %c0_21 = arith.constant 0 : index
    %46 = vector.load %arg9[%c0_18, %c0_19, %c0_20, %c0_21] : memref<1x3x2x128xf32, #tpu.memory_space<vmem>>, vector<1x1x2x128xf32>
    %47 = vector.shape_cast %46 : vector<1x1x2x128xf32> to vector<2x128xf32>
    %48 = vector.shape_cast %45 : vector<2x128xf32> to vector<1x1x2x128xf32>
    tpu.vector_store %arg9[%c0_18, %c0_19, %c0_20, %c0_21], %48 {strides = array<i32>} : memref<1x3x2x128xf32, #tpu.memory_space<vmem>>, vector<1x1x2x128xf32>,
    %cst_22 = arith.constant 1.000000e+00 : f32
    %49 = vector.broadcast %cst_22 : f32 to vector<2x128xf32>
    %50 = arith.cmpf ogt, %45, %49 : vector<2x128xf32>
    %cst_23 = arith.constant 0.000000e+00 : f32
    %51 = vector.broadcast %cst_23 : f32 to vector<2x128xf32>
    %52 = arith.select %50, %45, %51 : vector<2x128xi1>, vector<2x128xf32>
    %cst_24 = arith.constant dense<0.000000e+00> : vector<128xf32>
    %53 = vector.multi_reduction <add>, %52, %cst_24 [0] : vector<2x128xf32> to vector<128xf32>
    %54 = vector.shape_cast %53 : vector<128xf32> to vector<1x128xf32>
    %55 = arith.addf %23, %54 : vector<1x128xf32>
    %56 = arith.extui %50 : vector<2x128xi1> to vector<2x128xi32>
    %cst_25 = arith.constant dense<0> : vector<128xi32>
    %57 = vector.multi_reduction <add>, %56, %cst_25 [0] : vector<2x128xi32> to vector<128xi32>
    %58 = vector.shape_cast %57 : vector<128xi32> to vector<1x128xi32>
    %59 = arith.addi %24, %58 : vector<1x128xi32>
    %c1_26 = arith.constant 1 : index
    %c0_27 = arith.constant 0 : index
    %60 = memref.load %arg3[%c1_26, %c0_27] : memref<3x3xf32, #tpu.memory_space<smem>>
    %c0_28 = arith.constant 0 : index
    %c0_29 = arith.constant 0 : index
    %c0_30 = arith.constant 0 : index
    %c0_31 = arith.constant 0 : index
    %61 = vector.load %arg2[%c0_28, %c0_29, %c0_30, %c0_31] : memref<1x3x2x128xf32, #tpu.memory_space<vmem>>, vector<1x1x2x128xf32>
    %62 = vector.shape_cast %61 : vector<1x1x2x128xf32> to vector<2x128xf32>
    %63 = vector.broadcast %60 : f32 to vector<2x128xf32>
    %64 = arith.mulf %63, %62 : vector<2x128xf32>
    %c1_32 = arith.constant 1 : index
    %c1_33 = arith.constant 1 : index
    %65 = memref.load %arg3[%c1_32, %c1_33] : memref<3x3xf32, #tpu.memory_space<smem>>
    %c0_34 = arith.constant 0 : index
    %c1_35 = arith.constant 1 : index
    %c0_36 = arith.constant 0 : index
    %c0_37 = arith.constant 0 : index
    %66 = vector.load %arg2[%c0_34, %c1_35, %c0_36, %c0_37] : memref<1x3x2x128xf32, #tpu.memory_space<vmem>>, vector<1x1x2x128xf32>
    %67 = vector.shape_cast %66 : vector<1x1x2x128xf32> to vector<2x128xf32>
    %68 = vector.broadcast %65 : f32 to vector<2x128xf32>
    %69 = arith.mulf %68, %67 : vector<2x128xf32>
    %70 = arith.addf %64, %69 : vector<2x128xf32>
    %c1_38 = arith.constant 1 : index
    %c2_39 = arith.constant 2 : index
    %71 = memref.load %arg3[%c1_38, %c2_39] : memref<3x3xf32, #tpu.memory_space<smem>>
    %c0_40 = arith.constant 0 : index
    %c2_41 = arith.constant 2 : index
    %c0_42 = arith.constant 0 : index
    %c0_43 = arith.constant 0 : index
    %72 = vector.load %arg2[%c0_40, %c2_41, %c0_42, %c0_43] : memref<1x3x2x128xf32, #tpu.memory_space<vmem>>, vector<1x1x2x128xf32>
    %73 = vector.shape_cast %72 : vector<1x1x2x128xf32> to vector<2x128xf32>
    %74 = vector.broadcast %71 : f32 to vector<2x128xf32>
    %75 = arith.mulf %74, %73 : vector<2x128xf32>
    %76 = arith.addf %70, %75 : vector<2x128xf32>
    %c1_44 = arith.constant 1 : index
    %77 = memref.load %arg4[%c1_44] : memref<3xf32, #tpu.memory_space<smem>>
    %78 = vector.broadcast %77 : f32 to vector<2x128xf32>
    %79 = arith.addf %76, %78 : vector<2x128xf32>
    %80 = math.exp %79 : vector<2x128xf32>
    %c0_45 = arith.constant 0 : index
    %c1_46 = arith.constant 1 : index
    %c0_47 = arith.constant 0 : index
    %c0_48 = arith.constant 0 : index
    %81 = vector.load %arg9[%c0_45, %c1_46, %c0_47, %c0_48] : memref<1x3x2x128xf32, #tpu.memory_space<vmem>>, vector<1x1x2x128xf32>
    %82 = vector.shape_cast %81 : vector<1x1x2x128xf32> to vector<2x128xf32>
    %83 = vector.shape_cast %80 : vector<2x128xf32> to vector<1x1x2x128xf32>
    tpu.vector_store %arg9[%c0_45, %c1_46, %c0_47, %c0_48], %83 {strides = array<i32>} : memref<1x3x2x128xf32, #tpu.memory_space<vmem>>, vector<1x1x2x128xf32>,
    %cst_49 = arith.constant 1.000000e+00 : f32
    %84 = vector.broadcast %cst_49 : f32 to vector<2x128xf32>
    %85 = arith.cmpf ogt, %80, %84 : vector<2x128xf32>
    %cst_50 = arith.constant 0.000000e+00 : f32
    %86 = vector.broadcast %cst_50 : f32 to vector<2x128xf32>
    %87 = arith.select %85, %80, %86 : vector<2x128xi1>, vector<2x128xf32>
    %cst_51 = arith.constant dense<0.000000e+00> : vector<128xf32>
    %88 = vector.multi_reduction <add>, %87, %cst_51 [0] : vector<2x128xf32> to vector<128xf32>
    %89 = vector.shape_cast %88 : vector<128xf32> to vector<1x128xf32>
    %90 = arith.addf %55, %89 : vector<1x128xf32>
    %91 = arith.extui %85 : vector<2x128xi1> to vector<2x128xi32>
    %cst_52 = arith.constant dense<0> : vector<128xi32>
    %92 = vector.multi_reduction <add>, %91, %cst_52 [0] : vector<2x128xi32> to vector<128xi32>
    %93 = vector.shape_cast %92 : vector<128xi32> to vector<1x128xi32>
    %94 = arith.addi %59, %93 : vector<1x128xi32>
    %c2_53 = arith.constant 2 : index
    %c0_54 = arith.constant 0 : index
    %95 = memref.load %arg3[%c2_53, %c0_54] : memref<3x3xf32, #tpu.memory_space<smem>>
    %c0_55 = arith.constant 0 : index
    %c0_56 = arith.constant 0 : index
    %c0_57 = arith.constant 0 : index
    %c0_58 = arith.constant 0 : index
    %96 = vector.load %arg2[%c0_55, %c0_56, %c0_57, %c0_58] : memref<1x3x2x128xf32, #tpu.memory_space<vmem>>, vector<1x1x2x128xf32>
    %97 = vector.shape_cast %96 : vector<1x1x2x128xf32> to vector<2x128xf32>
    %98 = vector.broadcast %95 : f32 to vector<2x128xf32>
    %99 = arith.mulf %98, %97 : vector<2x128xf32>
    %c2_59 = arith.constant 2 : index
    %c1_60 = arith.constant 1 : index
    %100 = memref.load %arg3[%c2_59, %c1_60] : memref<3x3xf32, #tpu.memory_space<smem>>
    %c0_61 = arith.constant 0 : index
    %c1_62 = arith.constant 1 : index
    %c0_63 = arith.constant 0 : index
    %c0_64 = arith.constant 0 : index
    %101 = vector.load %arg2[%c0_61, %c1_62, %c0_63, %c0_64] : memref<1x3x2x128xf32, #tpu.memory_space<vmem>>, vector<1x1x2x128xf32>
    %102 = vector.shape_cast %101 : vector<1x1x2x128xf32> to vector<2x128xf32>
    %103 = vector.broadcast %100 : f32 to vector<2x128xf32>
    %104 = arith.mulf %103, %102 : vector<2x128xf32>
    %105 = arith.addf %99, %104 : vector<2x128xf32>
    %c2_65 = arith.constant 2 : index
    %c2_66 = arith.constant 2 : index
    %106 = memref.load %arg3[%c2_65, %c2_66] : memref<3x3xf32, #tpu.memory_space<smem>>
    %c0_67 = arith.constant 0 : index
    %c2_68 = arith.constant 2 : index
    %c0_69 = arith.constant 0 : index
    %c0_70 = arith.constant 0 : index
    %107 = vector.load %arg2[%c0_67, %c2_68, %c0_69, %c0_70] : memref<1x3x2x128xf32, #tpu.memory_space<vmem>>, vector<1x1x2x128xf32>
    %108 = vector.shape_cast %107 : vector<1x1x2x128xf32> to vector<2x128xf32>
    %109 = vector.broadcast %106 : f32 to vector<2x128xf32>
    %110 = arith.mulf %109, %108 : vector<2x128xf32>
    %111 = arith.addf %105, %110 : vector<2x128xf32>
    %c2_71 = arith.constant 2 : index
    %112 = memref.load %arg4[%c2_71] : memref<3xf32, #tpu.memory_space<smem>>
    %113 = vector.broadcast %112 : f32 to vector<2x128xf32>
    %114 = arith.addf %111, %113 : vector<2x128xf32>
    %115 = math.exp %114 : vector<2x128xf32>
    %c0_72 = arith.constant 0 : index
    %c2_73 = arith.constant 2 : index
    %c0_74 = arith.constant 0 : index
    %c0_75 = arith.constant 0 : index
    %116 = vector.load %arg9[%c0_72, %c2_73, %c0_74, %c0_75] : memref<1x3x2x128xf32, #tpu.memory_space<vmem>>, vector<1x1x2x128xf32>
    %117 = vector.shape_cast %116 : vector<1x1x2x128xf32> to vector<2x128xf32>
    %118 = vector.shape_cast %115 : vector<2x128xf32> to vector<1x1x2x128xf32>
    tpu.vector_store %arg9[%c0_72, %c2_73, %c0_74, %c0_75], %118 {strides = array<i32>} : memref<1x3x2x128xf32, #tpu.memory_space<vmem>>, vector<1x1x2x128xf32>,
    %cst_76 = arith.constant 1.000000e+00 : f32
    %119 = vector.broadcast %cst_76 : f32 to vector<2x128xf32>
    %120 = arith.cmpf ogt, %115, %119 : vector<2x128xf32>
    %cst_77 = arith.constant 0.000000e+00 : f32
    %121 = vector.broadcast %cst_77 : f32 to vector<2x128xf32>
    %122 = arith.select %120, %115, %121 : vector<2x128xi1>, vector<2x128xf32>
    %cst_78 = arith.constant dense<0.000000e+00> : vector<128xf32>
    %123 = vector.multi_reduction <add>, %122, %cst_78 [0] : vector<2x128xf32> to vector<128xf32>
    %124 = vector.shape_cast %123 : vector<128xf32> to vector<1x128xf32>
    %125 = arith.addf %90, %124 : vector<1x128xf32>
    %126 = arith.extui %120 : vector<2x128xi1> to vector<2x128xi32>
    %cst_79 = arith.constant dense<0> : vector<128xi32>
    %127 = vector.multi_reduction <add>, %126, %cst_79 [0] : vector<2x128xi32> to vector<128xi32>
    %128 = vector.shape_cast %127 : vector<128xi32> to vector<1x128xi32>
    %129 = arith.addi %94, %128 : vector<1x128xi32>
    %c0_80 = arith.constant 0 : index
    %c0_81 = arith.constant 0 : index
    %c0_82 = arith.constant 0 : index
    %c0_83 = arith.constant 0 : index
    %130 = vector.load %arg12[%c0_80, %c0_81, %c0_82, %c0_83] : memref<1x1x1x128xf32, #tpu.memory_space<vmem>>, vector<1x1x1x128xf32>
    %131 = vector.shape_cast %130 : vector<1x1x1x128xf32> to vector<1x128xf32>
    %132 = vector.shape_cast %125 : vector<1x128xf32> to vector<1x1x1x128xf32>
    tpu.vector_store %arg12[%c0_80, %c0_81, %c0_82, %c0_83], %132 {strides = array<i32>} : memref<1x1x1x128xf32, #tpu.memory_space<vmem>>, vector<1x1x1x128xf32>,
    %c0_84 = arith.constant 0 : index
    %c0_85 = arith.constant 0 : index
    %c0_86 = arith.constant 0 : index
    %c0_87 = arith.constant 0 : index
    %133 = vector.load %arg13[%c0_84, %c0_85, %c0_86, %c0_87] : memref<1x1x1x128xi32, #tpu.memory_space<vmem>>, vector<1x1x1x128xi32>
    %134 = vector.shape_cast %133 : vector<1x1x1x128xi32> to vector<1x128xi32>
    %135 = vector.shape_cast %129 : vector<1x128xi32> to vector<1x1x1x128xi32>
    tpu.vector_store %arg13[%c0_84, %c0_85, %c0_86, %c0_87], %135 {strides = array<i32>} : memref<1x1x1x128xi32, #tpu.memory_space<vmem>>, vector<1x1x1x128xi32>,
    %c0_88 = arith.constant 0 : index
    %c0_89 = arith.constant 0 : index
    %136 = memref.load %arg5[%c0_88, %c0_89] : memref<3x3xf32, #tpu.memory_space<smem>>
    %c0_90 = arith.constant 0 : index
    %c0_91 = arith.constant 0 : index
    %c0_92 = arith.constant 0 : index
    %c0_93 = arith.constant 0 : index
    %137 = vector.load %arg2[%c0_90, %c0_91, %c0_92, %c0_93] : memref<1x3x2x128xf32, #tpu.memory_space<vmem>>, vector<1x1x2x128xf32>
    %138 = vector.shape_cast %137 : vector<1x1x2x128xf32> to vector<2x128xf32>
    %139 = vector.broadcast %136 : f32 to vector<2x128xf32>
    %140 = arith.mulf %139, %138 : vector<2x128xf32>
    %c0_94 = arith.constant 0 : index
    %c1_95 = arith.constant 1 : index
    %141 = memref.load %arg5[%c0_94, %c1_95] : memref<3x3xf32, #tpu.memory_space<smem>>
    %c0_96 = arith.constant 0 : index
    %c1_97 = arith.constant 1 : index
    %c0_98 = arith.constant 0 : index
    %c0_99 = arith.constant 0 : index
    %142 = vector.load %arg2[%c0_96, %c1_97, %c0_98, %c0_99] : memref<1x3x2x128xf32, #tpu.memory_space<vmem>>, vector<1x1x2x128xf32>
    %143 = vector.shape_cast %142 : vector<1x1x2x128xf32> to vector<2x128xf32>
    %144 = vector.broadcast %141 : f32 to vector<2x128xf32>
    %145 = arith.mulf %144, %143 : vector<2x128xf32>
    %146 = arith.addf %140, %145 : vector<2x128xf32>
    %c0_100 = arith.constant 0 : index
    %c2_101 = arith.constant 2 : index
    %147 = memref.load %arg5[%c0_100, %c2_101] : memref<3x3xf32, #tpu.memory_space<smem>>
    %c0_102 = arith.constant 0 : index
    %c2_103 = arith.constant 2 : index
    %c0_104 = arith.constant 0 : index
    %c0_105 = arith.constant 0 : index
    %148 = vector.load %arg2[%c0_102, %c2_103, %c0_104, %c0_105] : memref<1x3x2x128xf32, #tpu.memory_space<vmem>>, vector<1x1x2x128xf32>
    %149 = vector.shape_cast %148 : vector<1x1x2x128xf32> to vector<2x128xf32>
    %150 = vector.broadcast %147 : f32 to vector<2x128xf32>
    %151 = arith.mulf %150, %149 : vector<2x128xf32>
    %152 = arith.addf %146, %151 : vector<2x128xf32>
    %c0_106 = arith.constant 0 : index
    %153 = memref.load %arg6[%c0_106] : memref<3xf32, #tpu.memory_space<smem>>
    %154 = vector.broadcast %153 : f32 to vector<2x128xf32>
    %155 = arith.addf %152, %154 : vector<2x128xf32>
    %c0_107 = arith.constant 0 : index
    %c0_108 = arith.constant 0 : index
    %c0_109 = arith.constant 0 : index
    %c0_110 = arith.constant 0 : index
    %156 = vector.load %arg10[%c0_107, %c0_108, %c0_109, %c0_110] : memref<1x3x2x128xf32, #tpu.memory_space<vmem>>, vector<1x1x2x128xf32>
    %157 = vector.shape_cast %156 : vector<1x1x2x128xf32> to vector<2x128xf32>
    %158 = vector.shape_cast %155 : vector<2x128xf32> to vector<1x1x2x128xf32>
    tpu.vector_store %arg10[%c0_107, %c0_108, %c0_109, %c0_110], %158 {strides = array<i32>} : memref<1x3x2x128xf32, #tpu.memory_space<vmem>>, vector<1x1x2x128xf32>,
    %159 = arith.mulf %155, %155 : vector<2x128xf32>
    %cst_111 = arith.constant 0.00999999977 : f32
    %160 = vector.broadcast %cst_111 : f32 to vector<2x128xf32>
    %161 = arith.cmpf ogt, %159, %160 : vector<2x128xf32>
    %cst_112 = arith.constant 0.000000e+00 : f32
    %162 = vector.broadcast %cst_112 : f32 to vector<2x128xf32>
    %163 = arith.select %161, %159, %162 : vector<2x128xi1>, vector<2x128xf32>
    %cst_113 = arith.constant dense<0.000000e+00> : vector<128xf32>
    %164 = vector.multi_reduction <add>, %163, %cst_113 [0] : vector<2x128xf32> to vector<128xf32>
    %165 = vector.shape_cast %164 : vector<128xf32> to vector<1x128xf32>
    %166 = arith.addf %23, %165 : vector<1x128xf32>
    %167 = arith.extui %161 : vector<2x128xi1> to vector<2x128xi32>
    %cst_114 = arith.constant dense<0> : vector<128xi32>
    %168 = vector.multi_reduction <add>, %167, %cst_114 [0] : vector<2x128xi32> to vector<128xi32>
    %169 = vector.shape_cast %168 : vector<128xi32> to vector<1x128xi32>
    %170 = arith.addi %24, %169 : vector<1x128xi32>
    %c1_115 = arith.constant 1 : index
    %c0_116 = arith.constant 0 : index
    %171 = memref.load %arg5[%c1_115, %c0_116] : memref<3x3xf32, #tpu.memory_space<smem>>
    %c0_117 = arith.constant 0 : index
    %c0_118 = arith.constant 0 : index
    %c0_119 = arith.constant 0 : index
    %c0_120 = arith.constant 0 : index
    %172 = vector.load %arg2[%c0_117, %c0_118, %c0_119, %c0_120] : memref<1x3x2x128xf32, #tpu.memory_space<vmem>>, vector<1x1x2x128xf32>
    %173 = vector.shape_cast %172 : vector<1x1x2x128xf32> to vector<2x128xf32>
    %174 = vector.broadcast %171 : f32 to vector<2x128xf32>
    %175 = arith.mulf %174, %173 : vector<2x128xf32>
    %c1_121 = arith.constant 1 : index
    %c1_122 = arith.constant 1 : index
    %176 = memref.load %arg5[%c1_121, %c1_122] : memref<3x3xf32, #tpu.memory_space<smem>>
    %c0_123 = arith.constant 0 : index
    %c1_124 = arith.constant 1 : index
    %c0_125 = arith.constant 0 : index
    %c0_126 = arith.constant 0 : index
    %177 = vector.load %arg2[%c0_123, %c1_124, %c0_125, %c0_126] : memref<1x3x2x128xf32, #tpu.memory_space<vmem>>, vector<1x1x2x128xf32>
    %178 = vector.shape_cast %177 : vector<1x1x2x128xf32> to vector<2x128xf32>
    %179 = vector.broadcast %176 : f32 to vector<2x128xf32>
    %180 = arith.mulf %179, %178 : vector<2x128xf32>
    %181 = arith.addf %175, %180 : vector<2x128xf32>
    %c1_127 = arith.constant 1 : index
    %c2_128 = arith.constant 2 : index
    %182 = memref.load %arg5[%c1_127, %c2_128] : memref<3x3xf32, #tpu.memory_space<smem>>
    %c0_129 = arith.constant 0 : index
    %c2_130 = arith.constant 2 : index
    %c0_131 = arith.constant 0 : index
    %c0_132 = arith.constant 0 : index
    %183 = vector.load %arg2[%c0_129, %c2_130, %c0_131, %c0_132] : memref<1x3x2x128xf32, #tpu.memory_space<vmem>>, vector<1x1x2x128xf32>
    %184 = vector.shape_cast %183 : vector<1x1x2x128xf32> to vector<2x128xf32>
    %185 = vector.broadcast %182 : f32 to vector<2x128xf32>
    %186 = arith.mulf %185, %184 : vector<2x128xf32>
    %187 = arith.addf %181, %186 : vector<2x128xf32>
    %c1_133 = arith.constant 1 : index
    %188 = memref.load %arg6[%c1_133] : memref<3xf32, #tpu.memory_space<smem>>
    %189 = vector.broadcast %188 : f32 to vector<2x128xf32>
    %190 = arith.addf %187, %189 : vector<2x128xf32>
    %c0_134 = arith.constant 0 : index
    %c1_135 = arith.constant 1 : index
    %c0_136 = arith.constant 0 : index
    %c0_137 = arith.constant 0 : index
    %191 = vector.load %arg10[%c0_134, %c1_135, %c0_136, %c0_137] : memref<1x3x2x128xf32, #tpu.memory_space<vmem>>, vector<1x1x2x128xf32>
    %192 = vector.shape_cast %191 : vector<1x1x2x128xf32> to vector<2x128xf32>
    %193 = vector.shape_cast %190 : vector<2x128xf32> to vector<1x1x2x128xf32>
    tpu.vector_store %arg10[%c0_134, %c1_135, %c0_136, %c0_137], %193 {strides = array<i32>} : memref<1x3x2x128xf32, #tpu.memory_space<vmem>>, vector<1x1x2x128xf32>,
    %194 = arith.mulf %190, %190 : vector<2x128xf32>
    %cst_138 = arith.constant 0.00999999977 : f32
    %195 = vector.broadcast %cst_138 : f32 to vector<2x128xf32>
    %196 = arith.cmpf ogt, %194, %195 : vector<2x128xf32>
    %cst_139 = arith.constant 0.000000e+00 : f32
    %197 = vector.broadcast %cst_139 : f32 to vector<2x128xf32>
    %198 = arith.select %196, %194, %197 : vector<2x128xi1>, vector<2x128xf32>
    %cst_140 = arith.constant dense<0.000000e+00> : vector<128xf32>
    %199 = vector.multi_reduction <add>, %198, %cst_140 [0] : vector<2x128xf32> to vector<128xf32>
    %200 = vector.shape_cast %199 : vector<128xf32> to vector<1x128xf32>
    %201 = arith.addf %166, %200 : vector<1x128xf32>
    %202 = arith.extui %196 : vector<2x128xi1> to vector<2x128xi32>
    %cst_141 = arith.constant dense<0> : vector<128xi32>
    %203 = vector.multi_reduction <add>, %202, %cst_141 [0] : vector<2x128xi32> to vector<128xi32>
    %204 = vector.shape_cast %203 : vector<128xi32> to vector<1x128xi32>
    %205 = arith.addi %170, %204 : vector<1x128xi32>
    %c2_142 = arith.constant 2 : index
    %c0_143 = arith.constant 0 : index
    %206 = memref.load %arg5[%c2_142, %c0_143] : memref<3x3xf32, #tpu.memory_space<smem>>
    %c0_144 = arith.constant 0 : index
    %c0_145 = arith.constant 0 : index
    %c0_146 = arith.constant 0 : index
    %c0_147 = arith.constant 0 : index
    %207 = vector.load %arg2[%c0_144, %c0_145, %c0_146, %c0_147] : memref<1x3x2x128xf32, #tpu.memory_space<vmem>>, vector<1x1x2x128xf32>
    %208 = vector.shape_cast %207 : vector<1x1x2x128xf32> to vector<2x128xf32>
    %209 = vector.broadcast %206 : f32 to vector<2x128xf32>
    %210 = arith.mulf %209, %208 : vector<2x128xf32>
    %c2_148 = arith.constant 2 : index
    %c1_149 = arith.constant 1 : index
    %211 = memref.load %arg5[%c2_148, %c1_149] : memref<3x3xf32, #tpu.memory_space<smem>>
    %c0_150 = arith.constant 0 : index
    %c1_151 = arith.constant 1 : index
    %c0_152 = arith.constant 0 : index
    %c0_153 = arith.constant 0 : index
    %212 = vector.load %arg2[%c0_150, %c1_151, %c0_152, %c0_153] : memref<1x3x2x128xf32, #tpu.memory_space<vmem>>, vector<1x1x2x128xf32>
    %213 = vector.shape_cast %212 : vector<1x1x2x128xf32> to vector<2x128xf32>
    %214 = vector.broadcast %211 : f32 to vector<2x128xf32>
    %215 = arith.mulf %214, %213 : vector<2x128xf32>
    %216 = arith.addf %210, %215 : vector<2x128xf32>
    %c2_154 = arith.constant 2 : index
    %c2_155 = arith.constant 2 : index
    %217 = memref.load %arg5[%c2_154, %c2_155] : memref<3x3xf32, #tpu.memory_space<smem>>
    %c0_156 = arith.constant 0 : index
    %c2_157 = arith.constant 2 : index
    %c0_158 = arith.constant 0 : index
    %c0_159 = arith.constant 0 : index
    %218 = vector.load %arg2[%c0_156, %c2_157, %c0_158, %c0_159] : memref<1x3x2x128xf32, #tpu.memory_space<vmem>>, vector<1x1x2x128xf32>
    %219 = vector.shape_cast %218 : vector<1x1x2x128xf32> to vector<2x128xf32>
    %220 = vector.broadcast %217 : f32 to vector<2x128xf32>
    %221 = arith.mulf %220, %219 : vector<2x128xf32>
    %222 = arith.addf %216, %221 : vector<2x128xf32>
    %c2_160 = arith.constant 2 : index
    %223 = memref.load %arg6[%c2_160] : memref<3xf32, #tpu.memory_space<smem>>
    %224 = vector.broadcast %223 : f32 to vector<2x128xf32>
    %225 = arith.addf %222, %224 : vector<2x128xf32>
    %c0_161 = arith.constant 0 : index
    %c2_162 = arith.constant 2 : index
    %c0_163 = arith.constant 0 : index
    %c0_164 = arith.constant 0 : index
    %226 = vector.load %arg10[%c0_161, %c2_162, %c0_163, %c0_164] : memref<1x3x2x128xf32, #tpu.memory_space<vmem>>, vector<1x1x2x128xf32>
    %227 = vector.shape_cast %226 : vector<1x1x2x128xf32> to vector<2x128xf32>
    %228 = vector.shape_cast %225 : vector<2x128xf32> to vector<1x1x2x128xf32>
    tpu.vector_store %arg10[%c0_161, %c2_162, %c0_163, %c0_164], %228 {strides = array<i32>} : memref<1x3x2x128xf32, #tpu.memory_space<vmem>>, vector<1x1x2x128xf32>,
    %229 = arith.mulf %225, %225 : vector<2x128xf32>
    %cst_165 = arith.constant 0.00999999977 : f32
    %230 = vector.broadcast %cst_165 : f32 to vector<2x128xf32>
    %231 = arith.cmpf ogt, %229, %230 : vector<2x128xf32>
    %cst_166 = arith.constant 0.000000e+00 : f32
    %232 = vector.broadcast %cst_166 : f32 to vector<2x128xf32>
    %233 = arith.select %231, %229, %232 : vector<2x128xi1>, vector<2x128xf32>
    %cst_167 = arith.constant dense<0.000000e+00> : vector<128xf32>
    %234 = vector.multi_reduction <add>, %233, %cst_167 [0] : vector<2x128xf32> to vector<128xf32>
    %235 = vector.shape_cast %234 : vector<128xf32> to vector<1x128xf32>
    %236 = arith.addf %201, %235 : vector<1x128xf32>
    %237 = arith.extui %231 : vector<2x128xi1> to vector<2x128xi32>
    %cst_168 = arith.constant dense<0> : vector<128xi32>
    %238 = vector.multi_reduction <add>, %237, %cst_168 [0] : vector<2x128xi32> to vector<128xi32>
    %239 = vector.shape_cast %238 : vector<128xi32> to vector<1x128xi32>
    %240 = arith.addi %205, %239 : vector<1x128xi32>
    %c0_169 = arith.constant 0 : index
    %c0_170 = arith.constant 0 : index
    %c0_171 = arith.constant 0 : index
    %c0_172 = arith.constant 0 : index
    %241 = vector.load %arg14[%c0_169, %c0_170, %c0_171, %c0_172] : memref<1x1x1x128xf32, #tpu.memory_space<vmem>>, vector<1x1x1x128xf32>
    %242 = vector.shape_cast %241 : vector<1x1x1x128xf32> to vector<1x128xf32>
    %243 = vector.shape_cast %236 : vector<1x128xf32> to vector<1x1x1x128xf32>
    tpu.vector_store %arg14[%c0_169, %c0_170, %c0_171, %c0_172], %243 {strides = array<i32>} : memref<1x1x1x128xf32, #tpu.memory_space<vmem>>, vector<1x1x1x128xf32>,
    %c0_173 = arith.constant 0 : index
    %c0_174 = arith.constant 0 : index
    %c0_175 = arith.constant 0 : index
    %c0_176 = arith.constant 0 : index
    %244 = vector.load %arg15[%c0_173, %c0_174, %c0_175, %c0_176] : memref<1x1x1x128xi32, #tpu.memory_space<vmem>>, vector<1x1x1x128xi32>
    %245 = vector.shape_cast %244 : vector<1x1x1x128xi32> to vector<1x128xi32>
    %246 = vector.shape_cast %240 : vector<1x128xi32> to vector<1x1x1x128xi32>
    tpu.vector_store %arg15[%c0_173, %c0_174, %c0_175, %c0_176], %246 {strides = array<i32>} : memref<1x1x1x128xi32, #tpu.memory_space<vmem>>, vector<1x1x1x128xi32>,
    %c0_177 = arith.constant 0 : index
    %c0_178 = arith.constant 0 : index
    %247 = memref.load %arg7[%c0_177, %c0_178] : memref<3x3xf32, #tpu.memory_space<smem>>
    %c0_179 = arith.constant 0 : index
    %c0_180 = arith.constant 0 : index
    %c0_181 = arith.constant 0 : index
    %c0_182 = arith.constant 0 : index
    %248 = vector.load %arg2[%c0_179, %c0_180, %c0_181, %c0_182] : memref<1x3x2x128xf32, #tpu.memory_space<vmem>>, vector<1x1x2x128xf32>
    %249 = vector.shape_cast %248 : vector<1x1x2x128xf32> to vector<2x128xf32>
    %250 = vector.broadcast %247 : f32 to vector<2x128xf32>
    %251 = arith.mulf %250, %249 : vector<2x128xf32>
    %c0_183 = arith.constant 0 : index
    %c1_184 = arith.constant 1 : index
    %252 = memref.load %arg7[%c0_183, %c1_184] : memref<3x3xf32, #tpu.memory_space<smem>>
    %c0_185 = arith.constant 0 : index
    %c1_186 = arith.constant 1 : index
    %c0_187 = arith.constant 0 : index
    %c0_188 = arith.constant 0 : index
    %253 = vector.load %arg2[%c0_185, %c1_186, %c0_187, %c0_188] : memref<1x3x2x128xf32, #tpu.memory_space<vmem>>, vector<1x1x2x128xf32>
    %254 = vector.shape_cast %253 : vector<1x1x2x128xf32> to vector<2x128xf32>
    %255 = vector.broadcast %252 : f32 to vector<2x128xf32>
    %256 = arith.mulf %255, %254 : vector<2x128xf32>
    %257 = arith.addf %251, %256 : vector<2x128xf32>
    %c0_189 = arith.constant 0 : index
    %c2_190 = arith.constant 2 : index
    %258 = memref.load %arg7[%c0_189, %c2_190] : memref<3x3xf32, #tpu.memory_space<smem>>
    %c0_191 = arith.constant 0 : index
    %c2_192 = arith.constant 2 : index
    %c0_193 = arith.constant 0 : index
    %c0_194 = arith.constant 0 : index
    %259 = vector.load %arg2[%c0_191, %c2_192, %c0_193, %c0_194] : memref<1x3x2x128xf32, #tpu.memory_space<vmem>>, vector<1x1x2x128xf32>
    %260 = vector.shape_cast %259 : vector<1x1x2x128xf32> to vector<2x128xf32>
    %261 = vector.broadcast %258 : f32 to vector<2x128xf32>
    %262 = arith.mulf %261, %260 : vector<2x128xf32>
    %263 = arith.addf %257, %262 : vector<2x128xf32>
    %c0_195 = arith.constant 0 : index
    %264 = memref.load %arg8[%c0_195] : memref<3xf32, #tpu.memory_space<smem>>
    %265 = vector.broadcast %264 : f32 to vector<2x128xf32>
    %266 = arith.addf %263, %265 : vector<2x128xf32>
    %267 = arith.negf %266 : vector<2x128xf32>
    %268 = math.exp %267 : vector<2x128xf32>
    %cst_196 = arith.constant 1.000000e+00 : f32
    %269 = vector.broadcast %cst_196 : f32 to vector<2x128xf32>
    %270 = arith.addf %269, %268 : vector<2x128xf32>
    %271 = arith.divf %269, %270 : vector<2x128xf32>
    %c0_197 = arith.constant 0 : index
    %c0_198 = arith.constant 0 : index
    %c0_199 = arith.constant 0 : index
    %c0_200 = arith.constant 0 : index
    %272 = vector.load %arg11[%c0_197, %c0_198, %c0_199, %c0_200] : memref<1x3x2x128xf32, #tpu.memory_space<vmem>>, vector<1x1x2x128xf32>
    %273 = vector.shape_cast %272 : vector<1x1x2x128xf32> to vector<2x128xf32>
    %274 = vector.shape_cast %271 : vector<2x128xf32> to vector<1x1x2x128xf32>
    tpu.vector_store %arg11[%c0_197, %c0_198, %c0_199, %c0_200], %274 {strides = array<i32>} : memref<1x3x2x128xf32, #tpu.memory_space<vmem>>, vector<1x1x2x128xf32>,
    %c0_201 = arith.constant 0 : index
    %c0_202 = arith.constant 0 : index
    %c0_203 = arith.constant 0 : index
    %c0_204 = arith.constant 0 : index
    %275 = vector.load %arg2[%c0_201, %c0_202, %c0_203, %c0_204] : memref<1x3x2x128xf32, #tpu.memory_space<vmem>>, vector<1x1x2x128xf32>
    %276 = vector.shape_cast %275 : vector<1x1x2x128xf32> to vector<2x128xf32>
    %277 = arith.subf %271, %276 : vector<2x128xf32>
    %278 = math.absf %277 : vector<2x128xf32>
    %cst_205 = arith.constant 0.000000e+00 : f32
    %279 = vector.broadcast %cst_205 : f32 to vector<2x128xf32>
    %280 = arith.select %22, %278, %279 : vector<2x128xi1>, vector<2x128xf32>
    %cst_206 = arith.constant dense<0.000000e+00> : vector<128xf32>
    %281 = vector.multi_reduction <add>, %280, %cst_206 [0] : vector<2x128xf32> to vector<128xf32>
    %282 = vector.shape_cast %281 : vector<128xf32> to vector<1x128xf32>
    %283 = arith.addf %23, %282 : vector<1x128xf32>
    %c1_207 = arith.constant 1 : index
    %c0_208 = arith.constant 0 : index
    %284 = memref.load %arg7[%c1_207, %c0_208] : memref<3x3xf32, #tpu.memory_space<smem>>
    %c0_209 = arith.constant 0 : index
    %c0_210 = arith.constant 0 : index
    %c0_211 = arith.constant 0 : index
    %c0_212 = arith.constant 0 : index
    %285 = vector.load %arg2[%c0_209, %c0_210, %c0_211, %c0_212] : memref<1x3x2x128xf32, #tpu.memory_space<vmem>>, vector<1x1x2x128xf32>
    %286 = vector.shape_cast %285 : vector<1x1x2x128xf32> to vector<2x128xf32>
    %287 = vector.broadcast %284 : f32 to vector<2x128xf32>
    %288 = arith.mulf %287, %286 : vector<2x128xf32>
    %c1_213 = arith.constant 1 : index
    %c1_214 = arith.constant 1 : index
    %289 = memref.load %arg7[%c1_213, %c1_214] : memref<3x3xf32, #tpu.memory_space<smem>>
    %c0_215 = arith.constant 0 : index
    %c1_216 = arith.constant 1 : index
    %c0_217 = arith.constant 0 : index
    %c0_218 = arith.constant 0 : index
    %290 = vector.load %arg2[%c0_215, %c1_216, %c0_217, %c0_218] : memref<1x3x2x128xf32, #tpu.memory_space<vmem>>, vector<1x1x2x128xf32>
    %291 = vector.shape_cast %290 : vector<1x1x2x128xf32> to vector<2x128xf32>
    %292 = vector.broadcast %289 : f32 to vector<2x128xf32>
    %293 = arith.mulf %292, %291 : vector<2x128xf32>
    %294 = arith.addf %288, %293 : vector<2x128xf32>
    %c1_219 = arith.constant 1 : index
    %c2_220 = arith.constant 2 : index
    %295 = memref.load %arg7[%c1_219, %c2_220] : memref<3x3xf32, #tpu.memory_space<smem>>
    %c0_221 = arith.constant 0 : index
    %c2_222 = arith.constant 2 : index
    %c0_223 = arith.constant 0 : index
    %c0_224 = arith.constant 0 : index
    %296 = vector.load %arg2[%c0_221, %c2_222, %c0_223, %c0_224] : memref<1x3x2x128xf32, #tpu.memory_space<vmem>>, vector<1x1x2x128xf32>
    %297 = vector.shape_cast %296 : vector<1x1x2x128xf32> to vector<2x128xf32>
    %298 = vector.broadcast %295 : f32 to vector<2x128xf32>
    %299 = arith.mulf %298, %297 : vector<2x128xf32>
    %300 = arith.addf %294, %299 : vector<2x128xf32>
    %c1_225 = arith.constant 1 : index
    %301 = memref.load %arg8[%c1_225] : memref<3xf32, #tpu.memory_space<smem>>
    %302 = vector.broadcast %301 : f32 to vector<2x128xf32>
    %303 = arith.addf %300, %302 : vector<2x128xf32>
    %304 = arith.negf %303 : vector<2x128xf32>
    %305 = math.exp %304 : vector<2x128xf32>
    %cst_226 = arith.constant 1.000000e+00 : f32
    %306 = vector.broadcast %cst_226 : f32 to vector<2x128xf32>
    %307 = arith.addf %306, %305 : vector<2x128xf32>
    %308 = arith.divf %306, %307 : vector<2x128xf32>
    %c0_227 = arith.constant 0 : index
    %c1_228 = arith.constant 1 : index
    %c0_229 = arith.constant 0 : index
    %c0_230 = arith.constant 0 : index
    %309 = vector.load %arg11[%c0_227, %c1_228, %c0_229, %c0_230] : memref<1x3x2x128xf32, #tpu.memory_space<vmem>>, vector<1x1x2x128xf32>
    %310 = vector.shape_cast %309 : vector<1x1x2x128xf32> to vector<2x128xf32>
    %311 = vector.shape_cast %308 : vector<2x128xf32> to vector<1x1x2x128xf32>
    tpu.vector_store %arg11[%c0_227, %c1_228, %c0_229, %c0_230], %311 {strides = array<i32>} : memref<1x3x2x128xf32, #tpu.memory_space<vmem>>, vector<1x1x2x128xf32>,
    %c0_231 = arith.constant 0 : index
    %c1_232 = arith.constant 1 : index
    %c0_233 = arith.constant 0 : index
    %c0_234 = arith.constant 0 : index
    %312 = vector.load %arg2[%c0_231, %c1_232, %c0_233, %c0_234] : memref<1x3x2x128xf32, #tpu.memory_space<vmem>>, vector<1x1x2x128xf32>
    %313 = vector.shape_cast %312 : vector<1x1x2x128xf32> to vector<2x128xf32>
    %314 = arith.subf %308, %313 : vector<2x128xf32>
    %315 = math.absf %314 : vector<2x128xf32>
    %cst_235 = arith.constant 0.000000e+00 : f32
    %316 = vector.broadcast %cst_235 : f32 to vector<2x128xf32>
    %317 = arith.select %22, %315, %316 : vector<2x128xi1>, vector<2x128xf32>
    %cst_236 = arith.constant dense<0.000000e+00> : vector<128xf32>
    %318 = vector.multi_reduction <add>, %317, %cst_236 [0] : vector<2x128xf32> to vector<128xf32>
    %319 = vector.shape_cast %318 : vector<128xf32> to vector<1x128xf32>
    %320 = arith.addf %283, %319 : vector<1x128xf32>
    %c2_237 = arith.constant 2 : index
    %c0_238 = arith.constant 0 : index
    %321 = memref.load %arg7[%c2_237, %c0_238] : memref<3x3xf32, #tpu.memory_space<smem>>
    %c0_239 = arith.constant 0 : index
    %c0_240 = arith.constant 0 : index
    %c0_241 = arith.constant 0 : index
    %c0_242 = arith.constant 0 : index
    %322 = vector.load %arg2[%c0_239, %c0_240, %c0_241, %c0_242] : memref<1x3x2x128xf32, #tpu.memory_space<vmem>>, vector<1x1x2x128xf32>
    %323 = vector.shape_cast %322 : vector<1x1x2x128xf32> to vector<2x128xf32>
    %324 = vector.broadcast %321 : f32 to vector<2x128xf32>
    %325 = arith.mulf %324, %323 : vector<2x128xf32>
    %c2_243 = arith.constant 2 : index
    %c1_244 = arith.constant 1 : index
    %326 = memref.load %arg7[%c2_243, %c1_244] : memref<3x3xf32, #tpu.memory_space<smem>>
    %c0_245 = arith.constant 0 : index
    %c1_246 = arith.constant 1 : index
    %c0_247 = arith.constant 0 : index
    %c0_248 = arith.constant 0 : index
    %327 = vector.load %arg2[%c0_245, %c1_246, %c0_247, %c0_248] : memref<1x3x2x128xf32, #tpu.memory_space<vmem>>, vector<1x1x2x128xf32>
    %328 = vector.shape_cast %327 : vector<1x1x2x128xf32> to vector<2x128xf32>
    %329 = vector.broadcast %326 : f32 to vector<2x128xf32>
    %330 = arith.mulf %329, %328 : vector<2x128xf32>
    %331 = arith.addf %325, %330 : vector<2x128xf32>
    %c2_249 = arith.constant 2 : index
    %c2_250 = arith.constant 2 : index
    %332 = memref.load %arg7[%c2_249, %c2_250] : memref<3x3xf32, #tpu.memory_space<smem>>
    %c0_251 = arith.constant 0 : index
    %c2_252 = arith.constant 2 : index
    %c0_253 = arith.constant 0 : index
    %c0_254 = arith.constant 0 : index
    %333 = vector.load %arg2[%c0_251, %c2_252, %c0_253, %c0_254] : memref<1x3x2x128xf32, #tpu.memory_space<vmem>>, vector<1x1x2x128xf32>
    %334 = vector.shape_cast %333 : vector<1x1x2x128xf32> to vector<2x128xf32>
    %335 = vector.broadcast %332 : f32 to vector<2x128xf32>
    %336 = arith.mulf %335, %334 : vector<2x128xf32>
    %337 = arith.addf %331, %336 : vector<2x128xf32>
    %c2_255 = arith.constant 2 : index
    %338 = memref.load %arg8[%c2_255] : memref<3xf32, #tpu.memory_space<smem>>
    %339 = vector.broadcast %338 : f32 to vector<2x128xf32>
    %340 = arith.addf %337, %339 : vector<2x128xf32>
    %341 = arith.negf %340 : vector<2x128xf32>
    %342 = math.exp %341 : vector<2x128xf32>
    %cst_256 = arith.constant 1.000000e+00 : f32
    %343 = vector.broadcast %cst_256 : f32 to vector<2x128xf32>
    %344 = arith.addf %343, %342 : vector<2x128xf32>
    %345 = arith.divf %343, %344 : vector<2x128xf32>
    %c0_257 = arith.constant 0 : index
    %c2_258 = arith.constant 2 : index
    %c0_259 = arith.constant 0 : index
    %c0_260 = arith.constant 0 : index
    %346 = vector.load %arg11[%c0_257, %c2_258, %c0_259, %c0_260] : memref<1x3x2x128xf32, #tpu.memory_space<vmem>>, vector<1x1x2x128xf32>
    %347 = vector.shape_cast %346 : vector<1x1x2x128xf32> to vector<2x128xf32>
    %348 = vector.shape_cast %345 : vector<2x128xf32> to vector<1x1x2x128xf32>
    tpu.vector_store %arg11[%c0_257, %c2_258, %c0_259, %c0_260], %348 {strides = array<i32>} : memref<1x3x2x128xf32, #tpu.memory_space<vmem>>, vector<1x1x2x128xf32>,
    %c0_261 = arith.constant 0 : index
    %c2_262 = arith.constant 2 : index
    %c0_263 = arith.constant 0 : index
    %c0_264 = arith.constant 0 : index
    %349 = vector.load %arg2[%c0_261, %c2_262, %c0_263, %c0_264] : memref<1x3x2x128xf32, #tpu.memory_space<vmem>>, vector<1x1x2x128xf32>
    %350 = vector.shape_cast %349 : vector<1x1x2x128xf32> to vector<2x128xf32>
    %351 = arith.subf %345, %350 : vector<2x128xf32>
    %352 = math.absf %351 : vector<2x128xf32>
    %cst_265 = arith.constant 0.000000e+00 : f32
    %353 = vector.broadcast %cst_265 : f32 to vector<2x128xf32>
    %354 = arith.select %22, %352, %353 : vector<2x128xi1>, vector<2x128xf32>
    %cst_266 = arith.constant dense<0.000000e+00> : vector<128xf32>
    %355 = vector.multi_reduction <add>, %354, %cst_266 [0] : vector<2x128xf32> to vector<128xf32>
    %356 = vector.shape_cast %355 : vector<128xf32> to vector<1x128xf32>
    %357 = arith.addf %320, %356 : vector<1x128xf32>
    %c0_267 = arith.constant 0 : index
    %c0_268 = arith.constant 0 : index
    %c0_269 = arith.constant 0 : index
    %c0_270 = arith.constant 0 : index
    %358 = vector.load %arg16[%c0_267, %c0_268, %c0_269, %c0_270] : memref<1x1x1x128xf32, #tpu.memory_space<vmem>>, vector<1x1x1x128xf32>
    %359 = vector.shape_cast %358 : vector<1x1x1x128xf32> to vector<1x128xf32>
    %360 = vector.shape_cast %357 : vector<1x128xf32> to vector<1x1x1x128xf32>
    tpu.vector_store %arg16[%c0_267, %c0_268, %c0_269, %c0_270], %360 {strides = array<i32>} : memref<1x1x1x128xf32, #tpu.memory_space<vmem>>, vector<1x1x1x128xf32>,
    return
  }
  func.func @transform_0(%arg0: i32, %arg1: i32) -> (i32, i32, i32, i32) {
    %c0_i32 = arith.constant 0 : i32
    %c0_i32_0 = arith.constant 0 : i32
    %c0_i32_1 = arith.constant 0 : i32
    return %arg0, %c0_i32, %arg1, %c0_i32_0 : i32, i32, i32, i32
  }
  func.func @transform_1(%arg0: i32, %arg1: i32) -> (i32, i32) {
    %c0_i32 = arith.constant 0 : i32
    %c0_i32_0 = arith.constant 0 : i32
    %c0_i32_1 = arith.constant 0 : i32
    return %c0_i32, %c0_i32_0 : i32, i32
  }
  func.func @transform_2(%arg0: i32, %arg1: i32) -> i32 {
    %c0_i32 = arith.constant 0 : i32
    %c0_i32_0 = arith.constant 0 : i32
    return %c0_i32 : i32
  }
  func.func @transform_3(%arg0: i32, %arg1: i32) -> (i32, i32) {
    %c0_i32 = arith.constant 0 : i32
    %c0_i32_0 = arith.constant 0 : i32
    %c0_i32_1 = arith.constant 0 : i32
    return %c0_i32, %c0_i32_0 : i32, i32
  }
  func.func @transform_4(%arg0: i32, %arg1: i32) -> i32 {
    %c0_i32 = arith.constant 0 : i32
    %c0_i32_0 = arith.constant 0 : i32
    return %c0_i32 : i32
  }
  func.func @transform_5(%arg0: i32, %arg1: i32) -> (i32, i32) {
    %c0_i32 = arith.constant 0 : i32
    %c0_i32_0 = arith.constant 0 : i32
    %c0_i32_1 = arith.constant 0 : i32
    return %c0_i32, %c0_i32_0 : i32, i32
  }
  func.func @transform_6(%arg0: i32, %arg1: i32) -> i32 {
    %c0_i32 = arith.constant 0 : i32
    %c0_i32_0 = arith.constant 0 : i32
    return %c0_i32 : i32
  }
  func.func @transform_7(%arg0: i32, %arg1: i32) -> (i32, i32, i32, i32) {
    %c0_i32 = arith.constant 0 : i32
    %c0_i32_0 = arith.constant 0 : i32
    %c0_i32_1 = arith.constant 0 : i32
    return %arg0, %c0_i32, %arg1, %c0_i32_0 : i32, i32, i32, i32
  }
  func.func @transform_8(%arg0: i32, %arg1: i32) -> (i32, i32, i32, i32) {
    %c0_i32 = arith.constant 0 : i32
    %c0_i32_0 = arith.constant 0 : i32
    %c0_i32_1 = arith.constant 0 : i32
    return %arg0, %c0_i32, %arg1, %c0_i32_0 : i32, i32, i32, i32
  }
  func.func @transform_9(%arg0: i32, %arg1: i32) -> (i32, i32, i32, i32) {
    %c0_i32 = arith.constant 0 : i32
    %c0_i32_0 = arith.constant 0 : i32
    %c0_i32_1 = arith.constant 0 : i32
    return %arg0, %c0_i32, %arg1, %c0_i32_0 : i32, i32, i32, i32
  }
  func.func @transform_10(%arg0: i32, %arg1: i32) -> (i32, i32, i32, i32) {
    %c0_i32 = arith.constant 0 : i32
    %c0_i32_0 = arith.constant 0 : i32
    %c0_i32_1 = arith.constant 0 : i32
    return %arg0, %arg1, %c0_i32, %c0_i32_0 : i32, i32, i32, i32
  }
  func.func @transform_11(%arg0: i32, %arg1: i32) -> (i32, i32, i32, i32) {
    %c0_i32 = arith.constant 0 : i32
    %c0_i32_0 = arith.constant 0 : i32
    %c0_i32_1 = arith.constant 0 : i32
    return %arg0, %arg1, %c0_i32, %c0_i32_0 : i32, i32, i32, i32
  }
  func.func @transform_12(%arg0: i32, %arg1: i32) -> (i32, i32, i32, i32) {
    %c0_i32 = arith.constant 0 : i32
    %c0_i32_0 = arith.constant 0 : i32
    %c0_i32_1 = arith.constant 0 : i32
    return %arg0, %arg1, %c0_i32, %c0_i32_0 : i32, i32, i32, i32
  }
  func.func @transform_13(%arg0: i32, %arg1: i32) -> (i32, i32, i32, i32) {
    %c0_i32 = arith.constant 0 : i32
    %c0_i32_0 = arith.constant 0 : i32
    %c0_i32_1 = arith.constant 0 : i32
    return %arg0, %arg1, %c0_i32, %c0_i32_0 : i32, i32, i32, i32
  }
  func.func @transform_14(%arg0: i32, %arg1: i32) -> (i32, i32, i32, i32) {
    %c0_i32 = arith.constant 0 : i32
    %c0_i32_0 = arith.constant 0 : i32
    %c0_i32_1 = arith.constant 0 : i32
    return %arg0, %arg1, %c0_i32, %c0_i32_0 : i32, i32, i32, i32
  }
}

</mosaic_0001>

<bundles_post_ra>
// kernel: tpu_custom_call.1
= control target key start
LH: loop header
LB: loop body
LE: loop exit
PB: predicated region body
PF: predicated region fallthrough
CT: control target
= control target key end

     0   :  { %s3065_s0 = inlined_call_operand.hbm [shape: f32[2,3,2,128], index: 0, kind: input, shape index: {}]   ;;  %s3066_s1 = inlined_call_operand.hbm [shape: f32[3,3], index: 1, kind: input, shape index: {}]   ;;  %s3067_s2 = inlined_call_operand.hbm [shape: f32[3], index: 2, kind: input, shape index: {}]   ;;  %s3068_s3 = inlined_call_operand.hbm [shape: f32[3,3], index: 3, kind: input, shape index: {}]   ;;  %s3069_s4 = inlined_call_operand.hbm [shape: f32[3], index: 4, kind: input, shape index: {}]   ;;  %s3070_s5 = inlined_call_operand.vmem [shape: f32[3,3], index: 5, kind: input, shape index: {}]   ;;  %s3071_s6 = inlined_call_operand.vmem [shape: f32[3], index: 6, kind: input, shape index: {}]   ;;  %s3072_s7 = inlined_call_operand.hbm [shape: f32[2,3,2,128], index: 7, kind: output, shape index: {0}]   ;;  %s3073_s8 = inlined_call_operand.hbm [shape: f32[2,3,2,128], index: 8, kind: output, shape index: {1}]   ;;  %s3074_s9 = inlined_call_operand.hbm [shape: f32[2,3,2,128], index: 9, kind: output, shape index: {2}]   ;;  %s3075_s10 = inlined_call_operand.hbm [shape: f32[2,1,1,128], index: 10, kind: output, shape index: {3}]   ;;  %s3076_s11 = inlined_call_operand.hbm [shape: s32[2,1,1,128], index: 11, kind: output, shape index: {4}]   ;;  %s3077_s12 = inlined_call_operand.hbm [shape: f32[2,1,1,128], index: 12, kind: output, shape index: {5}]   ;;  %s3078_s13 = inlined_call_operand.hbm [shape: s32[2,1,1,128], index: 13, kind: output, shape index: {6}]   ;;  %s3079_s14 = inlined_call_operand.hbm [shape: f32[2,1,1,128], index: 14, kind: output, shape index: {7}]  }
   0x1   :  { %3102 = sst [smem:[#allocation49_spill]] %s3065_s0 }
   0x2   :  { %3103 = sst [smem:[#allocation50_spill]] %s3066_s1 }
   0x3   :  { %3104 = sst [smem:[#allocation51_spill]] %s3067_s2 }
   0x4   :  { %3105 = sst [smem:[#allocation52_spill]] %s3068_s3 }
   0x5   :  { %3106 = sst [smem:[#allocation53_spill]] %s3069_s4 }
   0x6   :  { %3107 = sst [smem:[#allocation54_spill]] %s3070_s5 }
   0x7   :  { %3108 = sst [smem:[#allocation55_spill]] %s3071_s6 }
   0x8   :  { %3109 = sst [smem:[#allocation56_spill]] %s3072_s7 }
   0x9   :  { %3110 = sst [smem:[#allocation57_spill]] %s3073_s8 }
   0xa   :  { %3111 = sst [smem:[#allocation58_spill]] %s3074_s9 }
   0xb   :  { %3112 = sst [smem:[#allocation59_spill]] %s3079_s14 }
   0xc   :  { %20 = vsyncpa [#allocation3], 0 }
   0xd   :  { %22 = vsyncpa [#allocation3 + $0x1], 0 }
   0xe   :  { %23 = vsyncpa [#allocation5], 0 }
   0xf   :  { %24 = vsyncpa [#allocation9], 0 }
  0x10   :  { %25 = vsyncpa [#allocation12], 0 }
  0x11   :  { %26 = vsyncpa [#allocation6], 0 }
  0x12   :  { %27 = vsyncpa [#allocation15], 0 }
  0x13   :  { %28 = vsyncpa [#allocation4], 0 }
  0x14   :  { %30 = vsyncpa [#allocation4 + $0x1], 0 }
  0x15   :  { %31 = vsyncpa [#allocation18], 0 }
  0x16   :  { %33 = vsyncpa [#allocation18 + $0x1], 0 }
  0x17   :  { %34 = vsyncpa [#allocation21], 0 }
  0x18   :  { %36 = vsyncpa [#allocation21 + $0x1], 0 }
  0x19   :  { %37 = vsyncpa [#allocation24], 0 }
  0x1a   :  { %39 = vsyncpa [#allocation24 + $0x1], 0 }
  0x1b   :  { %40 = vsyncpa [#allocation27], 0 }
  0x1c   :  { %42 = vsyncpa [#allocation27 + $0x1], 0  ;;  %s2357_s29 = smov 0   ;;  %s2359_s30 = smov 0  }
  0x1d   :  { %s2361_s15 = smov 0   ;;  %s2363_s16 = smov 0  }
  0x1e   :  { %s2365_s17 = smov 0   ;;  %s2367_s18 = smov 0  }
  0x1f LB: > { %3113 = sst [smem:[#allocation39_spill]] %s2249_s29  ;;  %s2391_s22 = sadd.s32 4294967295, %s2269_s18   ;;  %s2269_s18 = sphi %s2367_s18, %s48_s18   ;;  %s2265_s17 = sphi %s2365_s17, %s3185_s17   ;;  %s2261_s16 = sphi %s2363_s16, %s3184_s16   ;;  %s2257_s15 = sphi %s2361_s15, %s3183_s15   ;;  %s2253_s30 = sphi %s2359_s30, %s3182_s30   ;;  %s2249_s29 = sphi %s2357_s29, %s3181_s29  }
  0x20   : > { %3114 = sst [smem:[#allocation40_spill]] %s2253_s30  ;;  %p1569_p0 = scmp.ge.s32.totalorder %s2269_s18, 1 }
  0x21   : > { %3115 = sst [smem:[#allocation41_spill]] %s2257_s15  ;;  %p83_p1 = scmp.eq.s32.totalorder %s2391_s22, 0 }
  0x22   : > { %3116 = sst [smem:[#allocation42_spill]] %s2265_s17  ;;  %p443_p2 = scmp.lt.s32.totalorder %s2269_s18, 3 }
  0x23   : > { %3117 = sst [smem:[#allocation43_spill]] %s2269_s18  ;;  %p1576_p4 = scmp.ge.s32.totalorder %s2269_s18, 2 }
  0x24   : > { %s3118_s2 = sld [smem:[#allocation51_spill]]  ;;  %p2396_p3 = pnand %p1569_p0, %p443_p2 }
  0x25   : > { %s3120_s1 = sld [smem:[#allocation50_spill]]  ;;  %s2272_s14 = smov [#allocation7]  }
  0x26   : > { %p1696_p5 = pneg %p2396_p3  ;;  %s3122_s3 = sld [smem:[#allocation52_spill]] }
  0x27   : > { %s3123_s4 = sld [smem:[#allocation53_spill]]  ;;  %s2273_s28 = smov [#allocation10]  }
  0x28   : > { %p2408_p6 = pnand %p1696_p5, %p83_p1  ;;  %s2274_s19 = smov [#allocation11]  }
  0x29   : > { %s3124_s5 = sld [smem:[#allocation54_spill]]  ;;  %s69_s24 = sadd.s32 1, %s2257_s15 }
  0x2a   : > { %s465_s21 = sshll.u32 %s3118_s2, 4  ;;  %s2271_s2 = smov [#allocation8]   ;;  %s466_s21 = int_to_ptr.hbm [resolvable:$true] %s465_s21 }
  0x2b   : > { %s455_s26 = sshll.u32 %s3120_s1, 4  ;;  %s3125_s6 = sld [smem:[#allocation55_spill]]  ;;  %s456_s26 = int_to_ptr.hbm [resolvable:$true] %s455_s26 }
  0x2c   : > { %s475_s20 = sshll.u32 %s3122_s3, 4  ;;  %p76_p8 = scmp.ne.s32.totalorder %s2257_s15, %s2253_s30  ;;  %s476_s20 = int_to_ptr.hbm [resolvable:$true] %s475_s20 }
  0x2d   : > { %s485_s1 = sshll.u32 %s3123_s4, 4  ;;  %p77_p9 = scmp.eq.s32.totalorder %s2269_s18, 0  ;;  %s486_s1 = int_to_ptr.hbm [resolvable:$true] %s485_s1 }
  0x2e   : > { %1702 = dma.hbm_to_smem (!%p2408_p6), %s466_s21, 16, %s2271_s2, [#allocation9]  }
  0x2f   : > { %1699 = dma.hbm_to_smem (!%p2408_p6), %s456_s26, 64, %s2272_s14, [#allocation5]  }
  0x30   : > { %1705 = dma.hbm_to_smem (!%p2408_p6), %s476_s20, 64, %s2273_s28, [#allocation9]  }
  0x31   : > { %1708 = dma.hbm_to_smem (!%p2408_p6), %s486_s1, 16, %s2274_s19, [#allocation12]  }
  0x32   : > { %s495_s2 = sshll.u32 %s3124_s5, 4  ;;  %s505_s26 = sshll.u32 %s3125_s6, 4  ;;  %s496_s2 = int_to_ptr.vmem [resolvable:$true] %s495_s2  ;;  %s506_s26 = int_to_ptr.vmem [resolvable:$true] %s505_s26 }
  0x33   : > { %s2275_s20 = smov [#allocation13]   ;;  %s2276_s28 = smov [#allocation14]  }
  0x34   : > { %1711 = dma.vmem_to_smem (!%p2408_p6), %s496_s2, 64, %s2275_s20, [#allocation6]  }
  0x35   : > { %1714 = dma.vmem_to_smem (!%p2408_p6), %s506_s26, 16, %s2276_s28, [#allocation15]  }
  0x36   : > { %s3082_s1 = sadd.s32 4294967294, %s2269_s18   ;;  %s60_s19 = sadd.s32 1, %s2265_s17 }
  0x37   : > { %p62_p7 = scmp.ge.s32.totalorder %s60_s19, 2  ;;  %p2444_p10 = por %p77_p9, %p76_p8 }
  0x38   : > { %p82_p11 = scmp.ne.s32.totalorder %s2253_s30, %s2249_s29  ;;  %p234_p12 = scmp.eq.s32.totalorder %s2391_s22, 1 }
  0x39   : > { %s3187_s19 = smov (%p62_p7, %s60_s19), 0  ;;  %p240_p5 = scmp.eq.s32.totalorder %s3082_s1, 1 }
  0x3a   : > { %3126 = sst [smem:[#allocation44_spill]] %s3187_s19  ;;  %s64_s27 = ssub.s32 %s2265_s17, %s3187_s19 }
  0x3b   : > { %p67_p13 = scmp.eq.s32.totalorder %s64_s27, 0  ;;  %p2455_p0 = por %p83_p1, %p82_p11 }
  0x3c   : > { %p2459_p2 = por %p234_p12, %p76_p8  ;;  %p2468_p6 = por %p240_p5, %p82_p11 }
  0x3d   : > { %s2466_s14 = scalar_select %p67_p13, %s2257_s15, %s69_s24  }
  0x3e   : > { %s3131_s26 = scalar_select %p2468_p6, 1, 0 }
  0x3f   : > { %3130 = sst [smem:[#allocation45_spill]] %s2466_s14  ;;  %p1750_p7 = scmp.lt.s32.totalorder %s2269_s18, 2 }
  0x40   : > { %3132 = sst [smem:[#allocation46_spill]] %s3131_s26  ;;  %s516_s20 = sand.u32 1, %s2257_s15  }
  0x41   : > { %s1649_s28 = smul.u32 6, %s2265_s17  ;;  %s3133_s0 = sld [smem:[#allocation49_spill]] }
  0x42   : > { %s1648_s27 = smul.u32 6, %s516_s20  ;;  %p1716_p8 = pnand %p1750_p7, %p2444_p10 }
  0x43   : > { %s517_s24 = scalar_lea.sflag [#allocation3], %s516_s20  ;;  %s2277_s14 = smov 32  }
  0x44   : > { %s520_s19 = scalar_lea.vmem [#allocation2], %s1648_s27  ;;  %s2278_s29 = smov 2  }
  0x45   : > { %s529_s1 = sshll.u32 %s520_s19, 4  ;;  %541 = sbr.rel (%p2396_p3) target bundleno = 273 (0x111), region = 48  ;;  %s530_s1 = int_to_ptr.vmem [resolvable:$true] %s529_s1 }
  0x47   : > { %s526_s5 = scalar_lea.hbm %s3133_s0, %s1649_s28 }
  0x48   : > { %s527_s6 = sshll.u32 %s526_s5, 4  ;;  %s528_s6 = int_to_ptr.hbm [resolvable:$true] %s527_s6 }
  0x49   : > { %1718 = dma.hbm_to_vmem [thread:$0]  (!%p1716_p8), %s528_s6, 96, %s530_s1, %s517_s24, %s2277_s14, %s2277_s14, %s2278_s29  }
  0x4a   : > { %s2483_s17 = sand.u32 1, %s2253_s30  }
  0x4b   : > { %s2486_s3 = smul.u32 6, %s2483_s17  ;;  %s544_s4 = scalar_lea.sflag [#allocation3], %s2483_s17 }
  0x4d   : > { %s2490_s5 = scalar_lea.vmem [#allocation2], %s2486_s3 }
  0x4e   : > { %2204 = dma.done.wait (%p2455_p0), %s544_s4, 96  }
  0x4f   : > { %2206 = vsyncadd (%p2455_p0), %s544_s4, 4294967200 }
  0x50   : > { %2208 = dma.done.wait (%p83_p1), [#allocation5], 64  }
  0x51   : > { %2210 = vsyncadd (%p83_p1), [#allocation5], 4294967232 }
  0x52   : > { %2212 = dma.done.wait (%p83_p1), [#allocation9], 80  }
  0x53   : > { %2214 = vsyncadd (%p83_p1), [#allocation9], 4294967216 }
  0x54   : > { %2216 = dma.done.wait (%p83_p1), [#allocation12], 16  }
  0x55   : > { %2218 = vsyncadd (%p83_p1), [#allocation12], 4294967280 }
  0x56   : > { %2220 = dma.done.wait (%p83_p1), [#allocation6], 64  }
  0x57   : > { %2222 = vsyncadd (%p83_p1), [#allocation6], 4294967232 }
  0x58   : > { %2224 = dma.done.wait (%p83_p1), [#allocation15], 16  }
  0x59   : > { %2226 = vsyncadd (%p83_p1), [#allocation15], 4294967280 }
  0x5a   : > { %583 = sfence }
  0x5b   : > { %s672_s6 = sld [smem:[#allocation7]]  ;;  %v673_v0 = vld [vmem:[%s2490_s5] sm:$0x3]  ;;  %v1586_v1 = vld [vmem:[%s2490_s5 + $0x2] sm:$0x3]  ;;  %vm696_vm0 = vcmask 1041408  }
  0x5c   : > { %s1585_s29 = sld [smem:[#allocation7 + $0x1]]  ;;  %v1588_v3 = vld [vmem:[%s2490_s5 + $0x4] sm:$0x3]  ;;  %v714_v8 = vld [vmem:[%s2490_s5] sm:$0x3] }
  0x5d   : > { %s1587_s23 = sld [smem:[#allocation7 + $0x2]]  ;;  %v1591_v10 = vld [vmem:[%s2490_s5 + $0x2] sm:$0x3]  ;;  %v1593_v13 = vld [vmem:[%s2490_s5 + $0x4] sm:$0x3] }
  0x5e   : > { %s2516_s1 = sld [smem:[#allocation8]]  ;;  %v754_v20 = vld [vmem:[%s2490_s5] sm:$0x3]  ;;  %v1598_v22 = vld [vmem:[%s2490_s5 + $0x2] sm:$0x3] }
  0x5f   : > { %s1589_s19 = sld [smem:[#allocation7 + $0x80]]  ;;  %v1600_v26 = vld [vmem:[%s2490_s5 + $0x4] sm:$0x3]  ;;  %v796_v34 = vld [vmem:[%s2490_s5] sm:$0x3] }
  0x60   : > { %s1590_s25 = sld [smem:[#allocation7 + $0x81]]  ;;  %v1604_v36 = vld [vmem:[%s2490_s5 + $0x2] sm:$0x3]  ;;  %v1606_v40 = vld [vmem:[%s2490_s5 + $0x4] sm:$0x3] }
  0x61   : > { %v674_v2 = vstv %s672_s6  ;;  %s1592_s2 = sld [smem:[#allocation7 + $0x82]]  ;;  %v833_v48 = vld [vmem:[%s2490_s5] sm:$0x3]  ;;  %v1609_v50 = vld [vmem:[%s2490_s5 + $0x2] sm:$0x3] }
  0x62   : > { %v675_v4 = vmul.f32 %v674_v2, %v673_v0  ;;  %v679_v5 = vstv %s1585_s29  ;;  %s2521_s14 = sld [smem:[#allocation8 + $0x1]]  ;;  %v1611_v54 = vld [vmem:[%s2490_s5 + $0x4] sm:$0x3]  ;;  %v655_v2 = vlaneseq }
  0x63   : > { %v680_v6 = vmul.f32 %v1586_v1, %v679_v5  ;;  %v685_v7 = vstv %s1587_s23  ;;  %s1596_s20 = sld [smem:[#allocation7 + $0x100]]  ;;  %v872_v1 = vld [vmem:[%s2490_s5] sm:$0x3] }
  0x64   : > { %v686_v9 = vmul.f32 %v1588_v3, %v685_v7  ;;  %s1597_s28 = sld [smem:[#allocation7 + $0x101]]  ;;  %v689_v14 = vstv %s2516_s1 }
  0x65   : > { %v681_v11 = vadd.f32 %v680_v6, %v675_v4  ;;  %v715_v12 = vstv %s1589_s19  ;;  %s1599_s27 = sld [smem:[#allocation7 + $0x102]]  ;;  %v1616_v6 = vld [vmem:[%s2490_s5 + $0x2] sm:$0x3] }
  0x66   : > { %v716_v15 = vmul.f32 %v715_v12, %v714_v8  ;;  %v719_v16 = vstv %s1590_s25  ;;  %s2527_s24 = sld [smem:[#allocation8 + $0x2]] }
  0x67   : > { %v687_v17 = vadd.f32 %v686_v9, %v681_v11  ;;  %v720_v18 = vmul.f32 %v1591_v10, %v719_v16  ;;  %v724_v19 = vstv %s1592_s2  ;;  %s795_s4 = sld [smem:[#allocation10]]  ;;  %v2279_v10 = vmov 0  }
  0x68   : > { %v725_v21 = vmul.f32 %v1593_v13, %v724_v19  ;;  %s2531_s6 = sld [smem:[#allocation10 + $0x1]]  ;;  %v728_v27 = vstv %s2521_s14 }
  0x69   : > { %v690_v23 = vadd.f32 %v689_v14, %v687_v17  ;;  %v721_v24 = vadd.f32 %v720_v18, %v716_v15  ;;  %v755_v25 = vstv %s1596_s20  ;;  %s2534_s29 = sld [smem:[#allocation10 + $0x2]] }
  0x6a   : > { %v756_v28 = vmul.f32 %v755_v25, %v754_v20  ;;  %v759_v29 = vstv %s1597_s28  ;;  %s2537_s23 = sld [smem:[#allocation11]] }
  0x6b   : > { %v691_v30 = vmul.f32 1.442695, %v690_v23  ;;  %v726_v31 = vadd.f32 %v725_v21, %v721_v24  ;;  %v760_v32 = vmul.f32 %v1598_v22, %v759_v29  ;;  %v764_v33 = vstv %s1599_s27  ;;  %s2540_s1 = sld [smem:[#allocation10 + $0x80]] }
  0x6c   : > { %v765_v35 = vmul.f32 %v1600_v26, %v764_v33  ;;  %s2543_s19 = sld [smem:[#allocation10 + $0x81]]  ;;  %v768_v41 = vstv %s2527_s24  ;;  %s2571_s24 = scalar_lea.vmem [#allocation16], %s2486_s3 }
  0x6d   : > { %1817 = vpow2.f32 %v691_v30  ;;  %v729_v37 = vadd.f32 %v728_v27, %v726_v31  ;;  %v761_v38 = vadd.f32 %v760_v32, %v756_v28  ;;  %v797_v39 = vstv %s795_s4  ;;  %s2546_s25 = sld [smem:[#allocation10 + $0x82]]  ;;  %s2586_s4 = scalar_lea.vmem [#allocation17], %s2486_s3  ;;  %v1618_v27 = vld [vmem:[%s2490_s5 + $0x4] sm:$0x3] }
  0x6e   : > { %v798_v42 = vmul.f32 %v797_v39, %v796_v34  ;;  %v801_v43 = vstv %s2531_s6  ;;  %s2550_s2 = sld [smem:[#allocation11 + $0x1]]  ;;  %s1122_s6 = sshll.u32 %s2586_s4, 4  ;;  %s2638_s6 = int_to_ptr.vmem [resolvable:$true] %s1122_s6 }
  0x6f   : > { %v730_v44 = vmul.f32 1.442695, %v729_v37  ;;  %v766_v45 = vadd.f32 %v765_v35, %v761_v38  ;;  %v802_v46 = vmul.f32 %v1604_v36, %v801_v43  ;;  %v806_v47 = vstv %s2534_s29  ;;  %s2554_s14 = sld [smem:[#allocation10 + $0x100]] }
  0x70   : > { %v807_v49 = vmul.f32 %v1606_v40, %v806_v47  ;;  %s2557_s20 = sld [smem:[#allocation10 + $0x101]]  ;;  %v810_v55 = vstv %s2537_s23  ;;  %s2630_s23 = sand.u32 1, %s2391_s22  }
  0x71   : > { %1819 = vpow2.f32 %v730_v44  ;;  %v769_v51 = vadd.f32 %v768_v41, %v766_v45  ;;  %v803_v52 = vadd.f32 %v802_v46, %v798_v42  ;;  %v834_v53 = vstv %s2540_s1  ;;  %s2561_s28 = sld [smem:[#allocation10 + $0x102]] }
  0x72   : > { %v835_v56 = vmul.f32 %v834_v53, %v833_v48  ;;  %v838_v57 = vstv %s2543_s19  ;;  %s2565_s27 = sld [smem:[#allocation11 + $0x2]]  ;;  %s2633_s19 = smul.u32 6, %s2261_s16 }
  0x73   : > { %v1818_v58 = vpop.eup %1817  ;;  %v770_v59 = vmul.f32 1.442695, %v769_v51  ;;  %v808_v60 = vadd.f32 %v807_v49, %v803_v52  ;;  %v839_v61 = vmul.f32 %v1609_v50, %v838_v57  ;;  %v843_v62 = vstv %s2546_s25  ;;  %s1104_s25 = sshll.u32 %s2571_s24, 4  ;;  %s3135_s8 = sld [smem:[#allocation57_spill]]  ;;  %s2660_s25 = int_to_ptr.vmem [resolvable:$true] %s1104_s25 }
  0x74   : > { %vm694_vm1 = vcmp.gt.f32.partialorder %v1818_v58, 1.0  ;;  %v844_v63 = vmul.f32 %v1611_v54, %v843_v62  ;;  %v847_v0 = vstv %s2550_s2  ;;  %693 = vst [vmem:[%s2571_s24] sm:$0x3] %v1818_v58  ;;  %s2649_s2 = sld [smem:[#allocation13 + $0x1]] }
  0x75   : > { %v695_v3 = vsel %vm694_vm1, %v1818_v58, 0.0  ;;  %1821 = vpow2.f32 %v770_v59  ;;  %v811_v4 = vadd.f32 %v810_v55, %v808_v60  ;;  %v840_v5 = vadd.f32 %v839_v61, %v835_v56  ;;  %s2657_s22 = sld [smem:[#allocation13 + $0x2]] }
  0x76   : > { %v697_v7 = vsel %vm696_vm0, %v695_v3, 0.0  ;;  %v873_v8 = vstv %s2554_s14  ;;  %v877_v9 = vstv %s2557_s20  ;;  %v2581_v11 = vsel %vm694_vm1, 1, %v2279_v10  ;;  %s3085_s14 = scalar_lea.vmem [#allocation20], %s2483_s17  ;;  %s3136_s7 = sld [smem:[#allocation56_spill]] }
  0x77   : > { %v2583_v12 = vpop.eup %1819  ;;  %v698_v13 = vrot.slane %v697_v7, 4  ;;  %812 = vst [vmem:[%s2586_s4] sm:$0x3] %v811_v4  ;;  %v813_v14 = vmul.f32 %v811_v4, %v811_v4  ;;  %v845_v15 = vadd.f32 %v844_v63, %v840_v5  ;;  %v874_v16 = vmul.f32 %v873_v8, %v872_v1  ;;  %s2618_s20 = sshll.u32 %s3085_s14, 4 }
  0x78   : > { %vm734_vm2 = vcmp.gt.f32.partialorder %v2583_v12, 1.0  ;;  %v878_v17 = vmul.f32 %v1616_v6, %v877_v9  ;;  %v882_v18 = vstv %s2561_s28  ;;  %v886_v19 = vstv %s2565_s27  ;;  %1595 = vst [vmem:[%s2571_s24 + $0x2] sm:$0x3] %v2583_v12  ;;  %3134 = sst [smem:[#allocation47_spill]] %s2618_s20 }
  0x79   : > { %v699_v20 = vadd.f32 %v698_v13, %v697_v7  ;;  %v735_v21 = vsel %vm734_vm2, %v2583_v12, 0.0  ;;  %vm814_vm3 = vcmp.gt.f32.partialorder %v813_v14, 0.01  ;;  %v848_v22 = vadd.f32 %v847_v0, %v845_v15  ;;  %s2641_s28 = sld [smem:[#allocation13]]  ;;  %s1121_s29 = scalar_lea.hbm %s3135_s8, %s2633_s19 }
  0x7a   : > { %v736_v23 = vsel %vm696_vm0, %v735_v21, 0.0  ;;  %v815_v24 = vsel %vm814_vm3, %v813_v14, 0.0  ;;  %v824_v25 = vsel %vm814_vm3, 1, %v2279_v10  ;;  %v879_v26 = vadd.f32 %v878_v17, %v874_v16  ;;  %s1975_s18 = scalar_lea.hbm %s3135_s8, 12 }
  0x7b   : > { %v2601_v28 = vpop.eup %1821  ;;  %v700_v29 = vrot.slane %v699_v20, 2  ;;  %v737_v30 = vrot.slane %v736_v23, 4  ;;  %v816_v31 = vsel %vm696_vm0, %v815_v24, 0.0  ;;  %v825_v32 = vsel %vm696_vm0, %v824_v25, 0  ;;  %1613 = vst [vmem:[%s2586_s4 + $0x2] sm:$0x3] %v848_v22 }
  0x7c   : > { %vm774_vm4 = vcmp.gt.f32.partialorder %v2601_v28, 1.0  ;;  %v817_v33 = vrot.slane %v816_v31, 4  ;;  %v826_v34 = vrot.slane %v825_v32, 4  ;;  %v851_v35 = vmul.f32 %v848_v22, %v848_v22  ;;  %1602 = vst [vmem:[%s2571_s24 + $0x4] sm:$0x3] %v2601_v28  ;;  %s2651_s24 = sshll.u32 %s1121_s29, 4  ;;  %s1125_s24 = int_to_ptr.hbm [resolvable:$true] %s2651_s24 }
  0x7d   : > { %v701_v36 = vadd.f32 %v700_v29, %v699_v20  ;;  %v738_v37 = vadd.f32 %v737_v30, %v736_v23  ;;  %v775_v38 = vsel %vm774_vm4, %v2601_v28, 0.0  ;;  %v883_v39 = vmul.f32 %v1618_v27, %v882_v18  ;;  %s1969_s1 = sshra.s32 %s1125_s24, 4  ;;  %s1970_s1 = int_to_ptr.hbm [resolvable:$true] %s1969_s1 }
  0x7e   : > { %v776_v40 = vsel %vm696_vm0, %v775_v38, 0.0  ;;  %v818_v41 = vadd.f32 %v817_v33, %v816_v31  ;;  %v2636_v42 = vadd.s32 %v826_v34, %v825_v32  ;;  %vm852_vm5 = vcmp.gt.f32.partialorder %v851_v35, 0.01  ;;  %s1971_s0 = scalar_lea.hbm %s1970_s1, 6  ;;  %p1976_p10 = scmp.lt.s32.totalorder %s1970_s1, %s3135_s8 }
  0x7f   : > { %v702_v43 = vrot.slane %v701_v36, 1  ;;  %v739_v44 = vrot.slane %v738_v37, 2  ;;  %v777_v45 = vrot.slane %v776_v40, 4  ;;  %v853_v46 = vsel %vm852_vm5, %v851_v35, 0.0  ;;  %p1972_p1 = scmp.ne.s32.totalorder %s1970_s1, %s1971_s0  ;;  %p1977_p11 = scmp.lt.s32.totalorder %s1975_s18, %s1971_s0 }
  0x80   : > { %v854_v47 = vsel %vm696_vm0, %v853_v46, 0.0  ;;  %v862_v48 = vsel %vm852_vm5, 1, %v2279_v10  ;;  %v884_v49 = vadd.f32 %v883_v39, %v879_v26  ;;  %v819_v50 = vrot.slane %v818_v41, 2 }
  0x81   : > { %v703_v51 = vadd.f32 %v702_v43, %v701_v36  ;;  %v740_v52 = vadd.f32 %v739_v44, %v738_v37  ;;  %v778_v53 = vadd.f32 %v777_v45, %v776_v40  ;;  %v855_v54 = vrot.slane %v854_v47, 4  ;;  %p1973_p3 = pnand %p1972_p1, %p2459_p2  ;;  %p1978_p12 = por %p1977_p11, %p1976_p10 }
  0x82   : > { %v863_v55 = vsel %vm696_vm0, %v862_v48, 0  ;;  %v887_v56 = vadd.f32 %v886_v19, %v884_v49  ;;  %v820_v57 = vadd.f32 %v819_v50, %v818_v41  ;;  %v706_v58 = vsel %vm696_vm0, %v2581_v11, 0 }
  0x83   : > { %v741_v59 = vrot.slane %v740_v52, 1  ;;  %v779_v60 = vrot.slane %v778_v53, 2  ;;  %v856_v61 = vadd.f32 %v855_v54, %v854_v47  ;;  %v864_v62 = vrot.slane %v863_v55, 4  ;;  %p1974_p9 = pneg %p1973_p3 }
  0x84   : > { %1620 = vst [vmem:[%s2586_s4 + $0x4] sm:$0x3] %v887_v56  ;;  %v890_v63 = vmul.f32 %v887_v56, %v887_v56  ;;  %v821_v0 = vrot.slane %v820_v57, 1  ;;  %v707_v1 = vrot.slane %v706_v58, 4  ;;  %v744_v3 = vsel %vm734_vm2, 1, %v2279_v10 }
  0x85   : > { %v742_v4 = vadd.f32 %v741_v59, %v740_v52  ;;  %v780_v5 = vadd.f32 %v779_v60, %v778_v53  ;;  %v2669_v6 = vadd.s32 %v864_v62, %v863_v55  ;;  %v857_v7 = vrot.slane %v856_v61, 2  ;;  %p1979_p13 = pnand %p1978_p12, %p1974_p9 }
  0x87   : > { %1982 = shalt.err (!%p1979_p13)
}
  0x88   : > { %s3090_s14 = smov 32   ;;  %s3092_s4 = smov 2   ;;  %vm891_vm6 = vcmp.gt.f32.partialorder %v890_v63, 0.01  ;;  %v822_v8 = vadd.f32 %v821_v0, %v820_v57  ;;  %v708_v9 = vadd.s32 %v707_v1, %v706_v58  ;;  %v745_v11 = vsel %vm696_vm0, %v744_v3, 0 }
  0x89   : > { %s3137_s30 = scalar_lea.sflag [#allocation18], %s2630_s23  ;;  %s2693_s0 = sld [smem:[#allocation14]]  ;;  %v743_v12 = vadd.f32 %v742_v4, %v703_v51  ;;  %v781_v13 = vrot.slane %v780_v5, 1  ;;  %v892_v14 = vsel %vm891_vm6, %v890_v63, 0.0  ;;  %v901_v15 = vsel %vm891_vm6, 1, %v2279_v10 }
  0x8a   : > { %1681 = dma.vmem_to_hbm [thread:$0]  (%p2459_p2), %s2638_s6, 96, %s1125_s24, %s3137_s30, %s3090_s14, %s3090_s14, %s3092_s4   ;;  %v893_v16 = vsel %vm696_vm0, %v892_v14, 0.0  ;;  %v902_v17 = vsel %vm696_vm0, %v901_v15, 0  ;;  %v858_v18 = vadd.f32 %v857_v7, %v856_v61  ;;  %v709_v19 = vrot.slane %v708_v9, 2 }
  0x8b   : > { %s2696_s15 = sld [smem:[#allocation13 + $0x80]]  ;;  %s3138_s6 = scalar_lea.hbm %s3136_s7, %s2633_s19  ;;  %v782_v20 = vadd.f32 %v781_v13, %v780_v5  ;;  %v894_v21 = vrot.slane %v893_v16, 4  ;;  %v903_v22 = vrot.slane %v902_v17, 4  ;;  %v746_v23 = vrot.slane %v745_v11, 4 }
  0x8c   : > { %s2703_s24 = sshll.u32 %s3138_s6, 4  ;;  %s3139_s30 = scalar_lea.hbm %s3075_s10, %s2261_s16  ;;  %s1107_s24 = int_to_ptr.hbm [resolvable:$true] %s2703_s24 }
  0x8d   : > { %s2712_s14 = sshll.u32 %s3139_s30, 4  ;;  %s1061_s18 = scalar_lea.sflag [#allocation4], %s2483_s17  ;;  %s1160_s14 = int_to_ptr.hbm [resolvable:$true] %s2712_s14 }
  0x8e   : > { %s1997_s1 = sshra.s32 %s1107_s24, 4  ;;  %s2003_s29 = scalar_lea.hbm %s3136_s7, 12  ;;  %s1998_s1 = int_to_ptr.hbm [resolvable:$true] %s1997_s1 }
  0x8f   : > { %s1999_s6 = scalar_lea.hbm %s1998_s1, 6  ;;  %p2004_p8 = scmp.lt.s32.totalorder %s1998_s1, %s3136_s7 }
  0x90   : > { %p2000_p0 = scmp.ne.s32.totalorder %s1998_s1, %s1999_s6  ;;  %p2005_p1 = scmp.lt.s32.totalorder %s2003_s29, %s1999_s6 }
  0x92   : > { %p2001_p5 = pnand %p2000_p0, %p2459_p2  ;;  %p2006_p3 = por %p2005_p1, %p2004_p8 }
  0x94   : > { %p2002_p7 = pneg %p2001_p5 }
  0x96   : > { %p2007_p9 = pnand %p2006_p3, %p2002_p7 }
  0x98   : > { %2010 = shalt.err (!%p2007_p9)
}
  0x99   : > { %s3140_s26 = smov 2   ;;  %s3141_s9 = smov 32   ;;  %v859_v24 = vrot.slane %v858_v18, 1  ;;  %v710_v25 = vadd.s32 %v709_v19, %v708_v9  ;;  %v784_v26 = vsel %vm774_vm4, 1, %v2279_v10  ;;  %v828_v27 = vrot.slane %v2636_v42, 2 }
  0x9a   : > { %1680 = dma.vmem_to_hbm [thread:$0]  (%p2459_p2), %s2660_s25, 96, %s1107_s24, %s1061_s18, %s3141_s9, %s3141_s9, %s3140_s26   ;;  %v783_v29 = vadd.f32 %v782_v20, %v743_v12  ;;  %v895_v30 = vadd.f32 %v894_v21, %v893_v16  ;;  %v747_v31 = vadd.s32 %v746_v23, %v745_v11  ;;  %v785_v32 = vsel %vm696_vm0, %v784_v26, 0 }
  0x9b   : > { %s2735_s8 = sld [smem:[#allocation13 + $0x81]]  ;;  %v860_v33 = vadd.f32 %v859_v24, %v858_v18  ;;  %s3096_s25 = scalar_lea.vmem [#allocation23], %s2483_s17  ;;  %v711_v28 = vrot.slane %v710_v25, 1  ;;  %v786_v10 = vrot.slane %v785_v32, 4  ;;  %v829_v34 = vadd.s32 %v828_v27, %v2636_v42  ;;  %v913_v43 = vld [vmem:[%s2490_s5] sm:$0x3] }
  0x9c   : > { %s2742_s4 = sshll.u32 %s3096_s25, 4  ;;  %s2745_s24 = sld [smem:[#allocation13 + $0x82]]  ;;  %v896_v35 = vrot.slane %v895_v30, 2  ;;  %v748_v36 = vrot.slane %v747_v31, 2  ;;  %v866_v37 = vrot.slane %v2669_v6, 2  ;;  %v904_v38 = vadd.s32 %v903_v22, %v902_v17 }
  0x9d   : > { %3142 = sst [smem:[#allocation48_spill]] %s2742_s4  ;;  %s3143_s18 = scalar_lea.vmem [#allocation20], %s2483_s17  ;;  %v861_v39 = vadd.f32 %v860_v33, %v822_v8  ;;  %v712_v40 = vadd.s32 %v711_v28, %v710_v25  ;;  %v787_v41 = vadd.s32 %v786_v10, %v785_v32  ;;  %v830_v42 = vrot.slane %v829_v34, 1 }
  0x9e   : > { %793 = vst [vmem:[%s3143_s18] sm:$0x1] %v783_v29  ;;  %s2750_s1 = sld [smem:[#allocation14 + $0x1]]  ;;  %s3098_s30 = scalar_lea.sflag [#allocation21], %s2630_s23 }
  0x9f   : > { %s2025_s18 = sshra.s32 %s1160_s14, 4  ;;  %s2031_s9 = scalar_lea.hbm %s3075_s10, 2  ;;  %s2026_s18 = int_to_ptr.hbm [resolvable:$true] %s2025_s18 }
  0xa0   : > { %s2027_s25 = scalar_lea.hbm %s2026_s18, 1  ;;  %p2032_p13 = scmp.lt.s32.totalorder %s2026_s18, %s3075_s10 }
  0xa1   : > { %p2028_p10 = scmp.ne.s32.totalorder %s2026_s18, %s2027_s25  ;;  %p2033_p0 = scmp.lt.s32.totalorder %s2031_s9, %s2027_s25 }
  0xa3   : > { %p2029_p11 = pnand %p2028_p10, %p2459_p2  ;;  %p2034_p5 = por %p2033_p0, %p2032_p13 }
  0xa5   : > { %p2030_p12 = pneg %p2029_p11 }
  0xa7   : > { %p2035_p7 = pnand %p2034_p5, %p2030_p12 }
  0xa9   : > { %2038 = shalt.err (!%p2035_p7)
}
  0xaa   : > { %s3144_s27 = sld [smem:[#allocation47_spill]]  ;;  %v897_v44 = vadd.f32 %v896_v35, %v895_v30  ;;  %v749_v45 = vadd.s32 %v748_v36, %v747_v31  ;;  %v867_v46 = vadd.s32 %v866_v37, %v2669_v6  ;;  %v905_v47 = vrot.slane %v904_v38, 2  ;;  %v1622_v48 = vld [vmem:[%s2490_s5 + $0x2] sm:$0x3]  ;;  %v1624_v53 = vld [vmem:[%s2490_s5 + $0x4] sm:$0x3]  ;;  %s3146_s25 = scalar_lea.hbm %s3077_s12, %s2261_s16 }
  0xab   : > { %s2778_s7 = sld [smem:[#allocation13 + $0x100]]  ;;  %v788_v49 = vrot.slane %v787_v41, 2  ;;  %v831_v50 = vadd.s32 %v830_v42, %v829_v34  ;;  %v914_v51 = vstv %s2641_s28  ;;  %v918_v52 = vstv %s2649_s2  ;;  %s3100_s18 = scalar_lea.vmem [#allocation25], %s2483_s17  ;;  %v2807_v3 = vld [vmem:[%s2490_s5] sm:$0x3] }
  0xac   : > { %s2783_s9 = sld [smem:[#allocation13 + $0x101]]  ;;  %v898_v54 = vrot.slane %v897_v44, 1  ;;  %v750_v55 = vrot.slane %v749_v45, 1  ;;  %v868_v56 = vrot.slane %v867_v46, 1  ;;  %v906_v57 = vadd.s32 %v905_v47, %v904_v38  ;;  %s2804_s6 = sshll.u32 %s3100_s18, 4  ;;  %s1200_s6 = int_to_ptr.vmem [resolvable:$true] %s2804_s6 }
  0xad   : > { %v789_v58 = vadd.s32 %v788_v49, %v787_v41  ;;  %v915_v59 = vmul.f32 %v914_v51, %v913_v43  ;;  %v919_v60 = vmul.f32 %v1622_v48, %v918_v52  ;;  %v923_v61 = vstv %s2657_s22  ;;  %s2809_s22 = sld [smem:[#allocation14 + $0x2]]  ;;  %v1628_v8 = vld [vmem:[%s2490_s5 + $0x2] sm:$0x3]  ;;  %s3147_s28 = scalar_lea.hbm %s3076_s11, %s2261_s16  ;;  %v1630_v14 = vld [vmem:[%s2490_s5 + $0x4] sm:$0x3] }
  0xae   : > { %v899_v62 = vadd.f32 %v898_v54, %v897_v44  ;;  %v751_v63 = vadd.s32 %v750_v55, %v749_v45  ;;  %v869_v0 = vadd.s32 %v868_v56, %v867_v46  ;;  %v907_v1 = vrot.slane %v906_v57, 1  ;;  %s3148_s18 = scalar_lea.hbm %s3078_s13, %s2261_s16  ;;  %v2834_v19 = vld [vmem:[%s2490_s5 + $0x2] sm:$0x3]  ;;  %v1011_v24 = vld [vmem:[%s2490_s5] sm:$0x3] }
  0xaf   : > { %v790_v4 = vrot.slane %v789_v58, 1  ;;  %v920_v5 = vadd.f32 %v919_v60, %v915_v59  ;;  %v924_v6 = vmul.f32 %v1624_v53, %v923_v61  ;;  %v927_v7 = vstv %s2693_s0  ;;  %s2825_s4 = sshll.u32 %s3148_s18, 4  ;;  %s3149_s0 = scalar_lea.vmem [#allocation23], %s2483_s17  ;;  %v1638_v25 = vld [vmem:[%s2490_s5 + $0x4] sm:$0x3]  ;;  %s1202_s4 = int_to_ptr.hbm [resolvable:$true] %s2825_s4 }
  0xb0   : > { %s3145_s26 = int_to_ptr.vmem [resolvable:$true] %s3144_s27  ;;  %s2799_s27 = sshll.u32 %s3146_s25, 4  ;;  %v900_v9 = vadd.f32 %v899_v62, %v861_v39  ;;  %v752_v11 = vadd.s32 %v751_v63, %v712_v40  ;;  %v870_v12 = vadd.s32 %v869_v0, %v831_v50  ;;  %v908_v13 = vadd.s32 %v907_v1, %v906_v57  ;;  %s1188_s27 = int_to_ptr.hbm [resolvable:$true] %s2799_s27 }
  0xb1   : > { %1683 = dma.vmem_to_hbm [thread:$0]  (%p2459_p2), %s3145_s26, 16, %s1160_s14, %s3098_s30   ;;  %v791_v15 = vadd.s32 %v790_v4, %v789_v58  ;;  %v925_v16 = vadd.f32 %v924_v6, %v920_v5  ;;  %v962_v17 = vstv %s2696_s15  ;;  %v966_v18 = vstv %s2735_s8 }
  0xb2   : > { %s2786_s26 = sld [smem:[#allocation13 + $0x102]]  ;;  %s3099_s14 = scalar_lea.vmem [#allocation22], %s2483_s17  ;;  %910 = vst [vmem:[%s3149_s0] sm:$0x1] %v900_v9  ;;  %v909_v20 = vadd.s32 %v908_v13, %v870_v12  ;;  %v963_v21 = vmul.f32 %v962_v17, %v2807_v3  ;;  %v967_v22 = vmul.f32 %v1628_v8, %v966_v18  ;;  %v971_v23 = vstv %s2745_s24 }
  0xb3   : > { %s2791_s20 = sshll.u32 %s3099_s14, 4  ;;  %s2818_s25 = sshll.u32 %s3147_s28, 4  ;;  %v792_v26 = vadd.s32 %v791_v15, %v752_v11  ;;  %v928_v27 = vadd.f32 %v927_v7, %v925_v16  ;;  %v972_v29 = vmul.f32 %v1630_v14, %v971_v23  ;;  %v975_v30 = vstv %s2750_s1  ;;  %s1172_s20 = int_to_ptr.vmem [resolvable:$true] %s2791_s20  ;;  %s1174_s25 = int_to_ptr.hbm [resolvable:$true] %s2818_s25 }
  0xb4   : > { %s1084_s15 = scalar_lea.sflag [#allocation24], %s2630_s23  ;;  %s2053_s8 = sshra.s32 %s1188_s27, 4  ;;  %s2054_s8 = int_to_ptr.hbm [resolvable:$true] %s2053_s8 }
  0xb5   : > { %s2055_s30 = scalar_lea.hbm %s2054_s8, 1  ;;  %s2059_s24 = scalar_lea.hbm %s3077_s12, 2 }
  0xb6   : > { %p2056_p8 = scmp.ne.s32.totalorder %s2054_s8, %s2055_s30  ;;  %p2060_p9 = scmp.lt.s32.totalorder %s2054_s8, %s3077_s12 }
  0xb7   : > { %p2061_p10 = scmp.lt.s32.totalorder %s2059_s24, %s2055_s30 }
  0xb8   : > { %p2057_p1 = pnand %p2056_p8, %p2459_p2 }
  0xb9   : > { %p2062_p11 = por %p2061_p10, %p2060_p9 }
  0xba   : > { %p2058_p3 = pneg %p2057_p1 }
  0xbc   : > { %p2063_p12 = pnand %p2062_p11, %p2058_p3 }
  0xbe   : > { %2066 = shalt.err (!%p2063_p12)
}
  0xbf   : > { %s3150_s1 = sld [smem:[#allocation48_spill]]  ;;  %s3152_s0 = scalar_lea.vmem [#allocation25], %s2483_s17  ;;  %v968_v31 = vadd.f32 %v967_v22, %v963_v21  ;;  %v1012_v32 = vstv %s2778_s7  ;;  %v1015_v33 = vstv %s2783_s9  ;;  %v1020_v28 = vstv %s2786_s26 }
  0xc0   : > { %911 = vst [vmem:[%s3152_s0] sm:$0x1] %v909_v20  ;;  %s3153_s8 = scalar_lea.vmem [#allocation22], %s2483_s17  ;;  %v1625_v10 = vmul.f32 -1.442695, %v928_v27  ;;  %v1013_v34 = vmul.f32 %v1012_v32, %v1011_v24  ;;  %v1016_v35 = vmul.f32 %v2834_v19, %v1015_v33  ;;  %v1021_v36 = vmul.f32 %v1638_v25, %v1020_v28  ;;  %s2081_s30 = sshra.s32 %s1202_s4, 4  ;;  %s2082_s30 = int_to_ptr.hbm [resolvable:$true] %s2081_s30 }
  0xc1   : > { %794 = vst [vmem:[%s3153_s8] sm:$0x1] %v792_v26  ;;  %s2083_s14 = scalar_lea.hbm %s2082_s30, 1  ;;  %s2087_s7 = scalar_lea.hbm %s3078_s13, 2 }
  0xc2   : > { %p2084_p13 = scmp.ne.s32.totalorder %s2082_s30, %s2083_s14  ;;  %p2088_p7 = scmp.lt.s32.totalorder %s2082_s30, %s3078_s13 }
  0xc3   : > { %p2089_p8 = scmp.lt.s32.totalorder %s2087_s7, %s2083_s14 }
  0xc4   : > { %p2085_p0 = pnand %p2084_p13, %p2459_p2 }
  0xc5   : > { %s3151_s28 = int_to_ptr.vmem [resolvable:$true] %s3150_s1  ;;  %p2090_p1 = por %p2089_p8, %p2088_p7 }
  0xc6   : > { %1685 = dma.vmem_to_hbm [thread:$0]  (%p2459_p2), %s3151_s28, 16, %s1188_s27, %s1084_s15  }
  0xc7   : > { %p2086_p5 = pneg %p2085_p0 }
  0xc9   : > { %p2091_p3 = pnand %p2090_p1, %p2086_p5 }
  0xcb   : > { %2094 = shalt.err (!%p2091_p3)
}
  0xcc   : > { %1686 = dma.vmem_to_hbm [thread:$0]  (%p2459_p2), %s1200_s6, 16, %s1202_s4, %s1084_s15   ;;  %v973_v37 = vadd.f32 %v972_v29, %v968_v31 }
  0xcd   : > { %s2109_s24 = sshra.s32 %s1174_s25, 4  ;;  %s2115_s28 = scalar_lea.hbm %s3076_s11, 2  ;;  %s2110_s24 = int_to_ptr.hbm [resolvable:$true] %s2109_s24 }
  0xce   : > { %s2111_s29 = scalar_lea.hbm %s2110_s24, 1  ;;  %p2116_p12 = scmp.lt.s32.totalorder %s2110_s24, %s3076_s11 }
  0xcf   : > { %p2112_p9 = scmp.ne.s32.totalorder %s2110_s24, %s2111_s29  ;;  %p2117_p13 = scmp.lt.s32.totalorder %s2115_s28, %s2111_s29 }
  0xd1   : > { %p2113_p10 = pnand %p2112_p9, %p2459_p2  ;;  %p2118_p0 = por %p2117_p13, %p2116_p12 }
  0xd3   : > { %p2114_p11 = pneg %p2113_p10 }
  0xd5   : > { %p2119_p5 = pnand %p2118_p0, %p2114_p11 }
  0xd7   : > { %2122 = shalt.err (!%p2119_p5)
}
  0xd8   : > { %s3154_s4 = scalar_lea.sflag [#allocation21], %s2630_s23  ;;  %1823 = vpow2.f32 %v1625_v10  ;;  %v1017_v38 = vadd.f32 %v1016_v35, %v1013_v34  ;;  %v656_v39 = vshrl.u32 %v655_v2, 7  ;;  %v976_v40 = vadd.f32 %v975_v30, %v973_v37  ;;  %v1642_v35 = vld [vmem:[%s2490_s5 + $0x4] sm:$0x3] }
  0xd9   : > { %1684 = dma.vmem_to_hbm [thread:$0]  (%p2459_p2), %s1172_s20, 16, %s1174_s25, %s3154_s4   ;;  %v1024_v41 = vstv %s2809_s22  ;;  %v658_v45 = vand.u32 127, %v655_v2 }
  0xda   : > { %v1022_v42 = vadd.f32 %v1021_v36, %v1017_v38  ;;  %v1632_v43 = vmul.f32 -1.442695, %v976_v40  ;;  %v659_v46 = vmul.u32 128, %v656_v39  ;;  %s2938_s20 = scalar_lea.vmem [#allocation19], %s2486_s3  ;;  %s3167_s25 = sld [smem:[#allocation58_spill]] }
  0xdb   : > { %s1140_s3 = sshll.u32 %s2938_s20, 4  ;;  %s1141_s3 = int_to_ptr.vmem [resolvable:$true] %s1140_s3 }
  0xdc   : > { %v1025_v44 = vadd.f32 %v1024_v41, %v1022_v42  ;;  %1825 = vpow2.f32 %v1632_v43  ;;  %v662_v50 = vadd.s32 %v659_v46, %v658_v45 }
  0xde   : > { %v1824_v47 = vpop.eup %1823  ;;  %v1640_v48 = vmul.f32 -1.442695, %v1025_v44  ;;  %v663_v53 = vshra.s32 %v662_v50, 4  ;;  %v664_v57 = vand.u32 15, %v662_v50 }
  0xdf   : > { %v932_v49 = vadd.f32 1.0, %v1824_v47 }
  0xe0   : > { %1827 = vpow2.f32 %v1640_v48  ;;  %vm2911_vm7 = vcmp.ge.s32.totalorder %v663_v53, 2  ;;  %vm2915_vm8 = vcmp.lt.s32.totalorder %v663_v53, 14  ;;  %vm668_vm12 = vcmp.ge.s32.totalorder %v664_v57, 2  ;;  %s1139_s15 = scalar_lea.hbm %s3167_s25, %s2633_s19  ;;  %s2143_s18 = scalar_lea.hbm %s3167_s25, 12 }
  0xe1   : > { %1829 = vrcp.f32 %v932_v49  ;;  %v944_v60 = vand.u32 2147483648, %v932_v49  ;;  %vm938_vm9 = vweird.f32 %v932_v49  ;;  %v942_v62 = vand.u32 2147483647, %v932_v49  ;;  %vm667_vm11 = vmand %vm2911_vm7, %vm2915_vm8  ;;  %s2967_s19 = sshll.u32 %s1139_s15, 4  ;;  %s1143_s19 = int_to_ptr.hbm [resolvable:$true] %s2967_s19 }
  0xe2   : > { %v1826_v51 = vpop.eup %1825  ;;  %vm2927_vm2 = vmand %vm667_vm11, %vm668_vm12  ;;  %vm2931_vm3 = vcmp.lt.s32.totalorder %v664_v57, 14  ;;  %s2137_s30 = sshra.s32 %s1143_s19, 4  ;;  %s2138_s30 = int_to_ptr.hbm [resolvable:$true] %s2137_s30 }
  0xe3   : > { %v980_v52 = vadd.f32 1.0, %v1826_v51  ;;  %v945_v5 = vor.u32 1.1754944e-38, %v944_v60  ;;  %vm943_vm14 = vcmp.eq.f32.partialorder %v942_v62, 8.507059e+37  ;;  %vm2955_vm7 = vmand %vm2927_vm2, %vm2931_vm3  ;;  %s2139_s14 = scalar_lea.hbm %s2138_s30, 6  ;;  %p2144_p3 = scmp.lt.s32.totalorder %s2138_s30, %s3167_s25 }
  0xe4   : > { %p2140_p7 = scmp.ne.s32.totalorder %s2138_s30, %s2139_s14  ;;  %p2145_p9 = scmp.lt.s32.totalorder %s2143_s18, %s2139_s14 }
  0xe5   : > { %1831 = vrcp.f32 %v980_v52  ;;  %v992_v1 = vand.u32 2147483648, %v980_v52  ;;  %vm986_vm15 = vweird.f32 %v980_v52  ;;  %v990_v11 = vand.u32 2147483647, %v980_v52 }
  0xe6   : > { %v1828_v54 = vpop.eup %1827  ;;  %p2141_p8 = pnand %p2140_p7, %p2459_p2  ;;  %p2146_p10 = por %p2145_p9, %p2144_p3 }
  0xe7   : > { %v1830_v55 = vpop.eup %1829  ;;  %v1029_v56 = vadd.f32 1.0, %v1828_v54  ;;  %v993_v15 = vor.u32 1.1754944e-38, %v992_v1  ;;  %vm991_vm8 = vcmp.eq.f32.partialorder %v990_v11, 8.507059e+37 }
  0xe8   : > { %v934_v58 = vmul.f32 %v1830_v55, %v932_v49  ;;  %vm939_vm10 = vweird.f32 %v1830_v55  ;;  %p2142_p1 = pneg %p2141_p8 }
  0xe9   : > { %1833 = vrcp.f32 %v1029_v56  ;;  %vm2923_vm13 = vmor %vm938_vm9, %vm939_vm10  ;;  %vm1035_vm4 = vweird.f32 %v1029_v56  ;;  %v1041_v20 = vand.u32 2147483648, %v1029_v56  ;;  %v1039_v24 = vand.u32 2147483647, %v1029_v56 }
  0xea   : > { %v935_v61 = vsub.f32 1.0, %v934_v58  ;;  %p2147_p11 = pnand %p2146_p10, %p2142_p1 }
  0xeb   : > { %v1832_v63 = vpop.eup %1831  ;;  %v1042_v31 = vor.u32 1.1754944e-38, %v1041_v20  ;;  %vm1040_vm10 = vcmp.eq.f32.partialorder %v1039_v24, 8.507059e+37 }
  0xec   : > { %v936_v0 = vmul.f32 %v1830_v55, %v935_v61  ;;  %v982_v6 = vmul.f32 %v1832_v63, %v980_v52  ;;  %vm987_vm1 = vweird.f32 %v1832_v63 }
  0xed   : > { %vm2943_vm5 = vmor %vm986_vm15, %vm987_vm1 }
  0xee   : > { %v937_v7 = vadd.f32 %v1830_v55, %v936_v0  ;;  %v983_v9 = vsub.f32 1.0, %v982_v6 }
  0xef   : > { %v1834_v8 = vpop.eup %1833 }
  0xf0   : > { %v941_v14 = vsel %vm2923_vm13, %v1830_v55, %v937_v7  ;;  %v1031_v16 = vmul.f32 %v1834_v8, %v1029_v56  ;;  %v984_v18 = vmul.f32 %v1832_v63, %v983_v9  ;;  %vm1036_vm6 = vweird.f32 %v1834_v8 }
  0xf1   : > { %v946_v17 = vsel %vm943_vm14, %v945_v5, %v941_v14  ;;  %vm2963_vm9 = vmor %vm1035_vm4, %vm1036_vm6 }
  0xf2   : > { %948 = vst [vmem:[%s2938_s20] sm:$0x3] %v946_v17  ;;  %v950_v21 = vsub.f32 %v946_v17, %v2807_v3  ;;  %v1032_v23 = vsub.f32 1.0, %v1031_v16  ;;  %v985_v3 = vadd.f32 %v1832_v63, %v984_v18 }
  0xf4   : > { %v951_v26 = vand.u32 2147483647, %v950_v21  ;;  %v1033_v27 = vmul.f32 %v1834_v8, %v1032_v23  ;;  %v989_v29 = vsel %vm2943_vm5, %v1832_v63, %v985_v3 }
  0xf5   : > { %v994_v33 = vsel %vm991_vm8, %v993_v15, %v989_v29 }
  0xf6   : > { %v952_v32 = vsel %vm2955_vm7, %v951_v26, 0.0  ;;  %v1034_v28 = vadd.f32 %v1834_v8, %v1033_v27  ;;  %1633 = vst [vmem:[%s2938_s20 + $0x2] sm:$0x3] %v994_v33  ;;  %v999_v34 = vsub.f32 %v994_v33, %v2834_v19 }
  0xf7   : > { %v953_v10 = vsel %vm696_vm0, %v952_v32, 0.0 }
  0xf8   : > { %v954_v36 = vrot.slane %v953_v10, 4  ;;  %v1038_v37 = vsel %vm2963_vm9, %v1834_v8, %v1034_v28  ;;  %v1000_v38 = vand.u32 2147483647, %v999_v34 }
  0xf9   : > { %v1043_v39 = vsel %vm1040_vm10, %v1042_v31, %v1038_v37 }
  0xfa   : > { %v955_v40 = vadd.f32 %v954_v36, %v953_v10  ;;  %1641 = vst [vmem:[%s2938_s20 + $0x4] sm:$0x3] %v1043_v39  ;;  %v1048_v41 = vsub.f32 %v1043_v39, %v1642_v35  ;;  %v1001_v42 = vsel %vm2955_vm7, %v1000_v38, 0.0 }
  0xfb   : > { %2150 = shalt.err (!%p2147_p11)
}
  0xfc   : > { %s3172_s26 = smov 2   ;;  %s3173_s24 = smov 32   ;;  %v956_v19 = vrot.slane %v955_v40, 2  ;;  %v1002_v43 = vsel %vm696_vm0, %v1001_v42, 0.0  ;;  %v1049_v44 = vand.u32 2147483647, %v1048_v41 }
  0xfd   : > { %s3174_s29 = scalar_lea.sflag [#allocation18], %s2630_s23  ;;  %v1003_v45 = vrot.slane %v1002_v43, 4  ;;  %s3175_s1 = sld [smem:[#allocation59_spill]] }
  0xfe   : > { %1682 = dma.vmem_to_hbm [thread:$0]  (%p2459_p2), %s1141_s3, 96, %s1143_s19, %s3174_s29, %s3173_s24, %s3173_s24, %s3172_s26   ;;  %v1050_v46 = vsel %vm2955_vm7, %v1049_v44, 0.0  ;;  %v957_v47 = vadd.f32 %v956_v19, %v955_v40 }
  0xff   : > { %v1004_v48 = vadd.f32 %v1003_v45, %v1002_v43  ;;  %v1051_v49 = vsel %vm696_vm0, %v1050_v46, 0.0  ;;  %s653_s0 = scalar_lea.vmem [#allocation26], %s2483_s17  ;;  %s1092_s20 = scalar_lea.sflag [#allocation27], %s2483_s17 }
 0x100   : > { %v1052_v50 = vrot.slane %v1051_v49, 4  ;;  %v958_v52 = vrot.slane %v957_v47, 1  ;;  %s1213_s8 = sshll.u32 %s653_s0, 4  ;;  %s1214_s8 = int_to_ptr.vmem [resolvable:$true] %s1213_s8 }
 0x101   : > { %v1005_v51 = vrot.slane %v1004_v48, 2 }
 0x102   : > { %v1053_v53 = vadd.f32 %v1052_v50, %v1051_v49  ;;  %v959_v56 = vadd.f32 %v958_v52, %v957_v47 }
 0x103   : > { %v1006_v54 = vadd.f32 %v1005_v51, %v1004_v48  ;;  %s1211_s28 = scalar_lea.hbm %s3175_s1, %s2261_s16  ;;  %s2171_s3 = scalar_lea.hbm %s3175_s1, 2 }
 0x104   : > { %v1054_v55 = vrot.slane %v1053_v53, 2  ;;  %s1215_s4 = sshll.u32 %s1211_s28, 4  ;;  %s1216_s4 = int_to_ptr.hbm [resolvable:$true] %s1215_s4 }
 0x105   : > { %v1007_v57 = vrot.slane %v1006_v54, 1  ;;  %s2165_s6 = sshra.s32 %s1216_s4, 4  ;;  %s2166_s6 = int_to_ptr.hbm [resolvable:$true] %s2165_s6 }
 0x106   : > { %v1055_v58 = vadd.f32 %v1054_v55, %v1053_v53  ;;  %s2167_s22 = scalar_lea.hbm %s2166_s6, 1  ;;  %p2172_p5 = scmp.lt.s32.totalorder %s2166_s6, %s3175_s1 }
 0x107   : > { %v1008_v59 = vadd.f32 %v1007_v57, %v1006_v54  ;;  %p2168_p12 = scmp.ne.s32.totalorder %s2166_s6, %s2167_s22  ;;  %p2173_p7 = scmp.lt.s32.totalorder %s2171_s3, %s2167_s22 }
 0x108   : > { %v1056_v2 = vrot.slane %v1055_v58, 1 }
 0x109   : > { %v1009_v60 = vadd.f32 %v1008_v59, %v959_v56  ;;  %p2169_p13 = pnand %p2168_p12, %p2459_p2  ;;  %p2174_p8 = por %p2173_p7, %p2172_p5 }
 0x10a   : > { %v1057_v61 = vadd.f32 %v1056_v2, %v1055_v58 }
 0x10b   : > { %p2170_p0 = pneg %p2169_p13 }
 0x10c   : > { %v1058_v62 = vadd.f32 %v1057_v61, %v1009_v60 }
 0x10d   : > { %p2175_p1 = pnand %p2174_p8, %p2170_p0 }
 0x10e   : > { %1059 = vst [vmem:[%s653_s0] sm:$0x1] %v1058_v62 }
 0x10f   : > { %2178 = shalt.err (!%p2175_p1)
}
 0x110   : > { %1687 = dma.vmem_to_hbm [thread:$0]  (%p2459_p2), %s1214_s8, 16, %s1216_s4, %s1092_s20  }
 0x111 PF: > { %s3176_s17 = sld [smem:[#allocation39_spill]]  ;;  %p1720_p3 = pnand %p1576_p4, %p2468_p6 }
 0x112   : > { %s3178_s5 = sld [smem:[#allocation43_spill]] }
 0x113   : > { %p3021_p9 = pneg %p1720_p3 }
 0x117   : > { %s1227_s27 = sand.u32 1, %s3176_s17  }
 0x118   : > { %s1228_s7 = scalar_lea.sflag [#allocation4], %s1227_s27 }
 0x119   : > { %2228 = dma.done.wait (%p3021_p9), %s1228_s7, 96  }
 0x11a   : > { %2230 = vsyncadd (%p3021_p9), %s1228_s7, 4294967200  ;;  %s3180_s21 = sadd.s32 4294967294, %s3178_s5  }
 0x11b   : > { %s1237_s9 = sand.u32 1, %s3180_s21  }
 0x11c   : > { %s1238_s26 = scalar_lea.sflag [#allocation18], %s1237_s9 }
 0x11d   : > { %2232 = dma.done.wait (%p3021_p9), %s1238_s26, 192  }
 0x11e   : > { %2234 = vsyncadd (%p3021_p9), %s1238_s26, 4294967104  ;;  %s1258_s24 = scalar_lea.sflag [#allocation21], %s1237_s9 }
 0x11f   : > { %2236 = dma.done.wait (%p3021_p9), %s1258_s24, 32  }
 0x120   : > { %2238 = vsyncadd (%p3021_p9), %s1258_s24, 4294967264  ;;  %s1276_s29 = scalar_lea.sflag [#allocation24], %s1237_s9 }
 0x121   : > { %2240 = dma.done.wait (%p3021_p9), %s1276_s29, 32  }
 0x122   : > { %2242 = vsyncadd (%p3021_p9), %s1276_s29, 4294967264  ;;  %s1294_s23 = scalar_lea.sflag [#allocation27], %s1227_s27 }
 0x123   : > { %2244 = dma.done.wait (%p3021_p9), %s1294_s23, 16  }
 0x124   : > { %2246 = vsyncadd (%p3021_p9), %s1294_s23, 4294967280  ;;  %s48_s18 = sadd.s32 1, %s3178_s5   ;;  %s3181_s29 = sld [smem:[#allocation40_spill]] }
 0x125   : > { %p45_p4 = scmp.ge.s32.totalorder %s48_s18, 4   ;;  %s3182_s30 = sld [smem:[#allocation41_spill]] }
 0x126   : > { %s3183_s15 = sld [smem:[#allocation45_spill]] }
 0x127   : > { %s3184_s16 = sld [smem:[#allocation42_spill]]  ;;  %47 = sbr.rel (!%p45_p4) target bundleno = 31 (0x1f), region = 240 }
 0x128   : > { %s3185_s17 = sld [smem:[#allocation44_spill]] }
 0x12c   :  { %1299 = vsyncpa [#allocation3], 1 }
 0x12d   :  { %1301 = vsyncpa [#allocation3 + $0x1], 1 }
 0x12e   :  { %1302 = vsyncpa [#allocation4], 1 }
 0x12f   :  { %1304 = vsyncpa [#allocation4 + $0x1], 1 }
 0x130   :  { %1305 = vsyncpa [#allocation18], 1 }
 0x131   :  { %1307 = vsyncpa [#allocation18 + $0x1], 1 }
 0x132   :  { %1308 = vsyncpa [#allocation21], 1 }
 0x133   :  { %1310 = vsyncpa [#allocation21 + $0x1], 1 }
 0x134   :  { %1311 = vsyncpa [#allocation24], 1 }
 0x135   :  { %1313 = vsyncpa [#allocation24 + $0x1], 1 }
 0x136   :  { %1314 = vsyncpa [#allocation27], 1 }
 0x137   :  { %1316 = vsyncpa [#allocation27 + $0x1], 1 }
 0x138   :  { %1317 = vsyncpa [#allocation5], 1 }
 0x139   :  { %1319 = vsyncpa [#allocation5 + $0x1], 1 }
 0x13a   :  { %1320 = vsyncpa [#allocation9], 1 }
 0x13b   :  { %1321 = vsyncpa [#allocation12], 1 }
 0x13c   :  { %1322 = vsyncpa [#allocation6], 1 }
 0x13d   :  { %1324 = vsyncpa [#allocation6 + $0x1], 1 }
 0x13e   :  { %1325 = vsyncpa [#allocation15], 1 }

</bundles_post_ra>
